<compile_context>
chip_gen: v7x
topology: tpu7x:2x2x1
jax: 0.10.0
libtpu: 0.0.40
codegen_flags: <defaults>
</compile_context>

<pallas_src>
import numpy as np
import jax
import jax.numpy as jnp
from jax import lax
from jax.experimental import pallas as pl
from jax.experimental.pallas import tpu as pltpu

BT = 8        # images per grid step (conv1 matmul M = BT*32 = 256 rows)
BAND1 = 32    # rows per image in the conv1 slab (28 data rows + ky padding/slack)
BAND2 = 16    # rows per image in the conv2 slab (14 data rows + padding/slack)


# ----------------------------------------------------------------------------
# Host-side weight repacking (done once, outside jit)
# ----------------------------------------------------------------------------
def _conv_toeplitz(w_conv, width):
    """(Cout,Cin,3,3) -> (3, Cin*width, Cout*width) banded matrices over the
    UNPADDED width (kx zero-padding folded into all-zero rows):
      T[ky, ci*width+p, co*width+w] = w[co, ci, ky, p - w + 1]  for 0<=p-w+1<=2
    so   conv_out(h, co*width+w) = sum_ky rows[h+ky-1, :] @ T[ky]
    with rows[-1] / rows[H] being zero rows (handled by the band layout)."""
    w_np = np.asarray(w_conv, np.float32)
    cout, cin, kh, kw = w_np.shape
    assert (kh, kw) == (3, 3)
    t = np.zeros((3, cin, width, cout, width), np.float32)
    for ky in range(3):
        for kx in range(3):
            for w in range(width):
                p = w + kx - 1
                if 0 <= p < width:
                    t[ky, :, p, :, w] = w_np[:, :, ky, kx].T        # (Cin, Cout)
    return t.reshape(3, cin * width, cout * width)


def _pool_col_selector(cin, width):
    """0/1 (cin*width-1, cin*(width//2)): column ci*(width//2)+c of the result
    picks column ci*width + 2c of the width-wise pairwise-max slab."""
    half = width // 2
    s = np.zeros((cin * width - 1, cin * half), np.float32)
    for ci in range(cin):
        for c in range(half):
            s[ci * width + 2 * c, ci * half + c] = 1.0
    return s


def _pool1_row_mask():
    """(BT*16, 1) 0/1 mask zeroing the 2 pad/garbage rows of each 16-row band
    so they act as conv2's ky zero padding."""
    m = np.ones((BT * BAND2, 1), np.float32)
    for r in range(BT * BAND2):
        if (r % BAND2) >= 14:
            m[r, 0] = 0.0
    return m


def pack_params(params):
    """Repack raw (PyTorch-layout) parameters into the kernel's weight layout."""
    w1c, b1c, w2c, b2c, w1f, b1f, w2f, b2f = params
    bf16 = jnp.bfloat16
    t1 = jnp.asarray(_conv_toeplitz(w1c, 28), bf16)                  # (3, 28, 112)
    t2 = jnp.asarray(_conv_toeplitz(w2c, 14), bf16)                  # (3, 56, 112)
    s1 = jnp.asarray(_pool_col_selector(4, 28), bf16)                # (111, 56)
    s2 = jnp.asarray(_pool_col_selector(8, 14), bf16)                # (111, 56)
    b1r = jnp.asarray(np.repeat(np.asarray(b1c, np.float32), 28)[None, :])  # (1,112)
    b2r = jnp.asarray(np.repeat(np.asarray(b2c, np.float32), 14)[None, :])  # (1,112)
    # fc1 weight rows are ordered c*49 + h*7 + w; kernel consumes per-h slices
    # over a (c*7 + w) lane layout.
    w1p = jnp.asarray(np.asarray(w1f, np.float32).reshape(8, 7, 7, 32)
                      .transpose(1, 0, 2, 3).reshape(7, 56, 32), bf16)      # (7,56,32)
    b1fr = jnp.asarray(np.asarray(b1f, np.float32)[None, :])                # (1, 32)
    w2p = jnp.asarray(np.asarray(w2f, np.float32), bf16)                    # (32, 10)
    b2fr = jnp.asarray(np.asarray(b2f, np.float32)[None, :])                # (1, 10)
    mask = jnp.asarray(_pool1_row_mask())                                   # (128, 1)
    return (t1, b1r, s1, t2, b2r, s2, w1p, b1fr, w2p, b2fr, mask)


# ----------------------------------------------------------------------------
# Fused forward kernel (BT images per grid step, batch stacked on sublanes)
# ----------------------------------------------------------------------------
def simple_cnn_kernel(x_ref, mask_ref, t1_ref, b1c_ref, s1_ref,
                      t2_ref, b2c_ref, s2_ref, w1f_ref, b1f_ref,
                      w2f_ref, b2f_ref, out_ref, scr1, scr2):
    f32, bf16 = jnp.float32, jnp.bfloat16

    def mm(a, b):                          # bf16 x bf16 MXU dot, f32 accumulate
        return jnp.dot(a.astype(bf16), b, preferred_element_type=f32)

    # ---- conv1 (1->4 ch, 3x3, pad 1) + ReLU ---------------------------------
    # x: (BT*32, 28); per-image band rows 1..28 hold the image, 0 / 29..31 zero.
    x = x_ref[...]
    n1 = x.shape[0]
    xs1 = pltpu.roll(x, n1 - 1, axis=0)    # [j] = x[j+1] (wrap hits garbage rows only)
    xs2 = pltpu.roll(x, n1 - 2, axis=0)    # [j] = x[j+2]
    a1 = mm(x, t1_ref[0])                  # chained accumulate (MRB-friendly)
    a1 = a1 + mm(xs1, t1_ref[1])
    a1 = a1 + mm(xs2, t1_ref[2])
    a1 = jnp.maximum(a1 + b1c_ref[...], 0.0)     # (BT*32, 112); band rows 0..27 valid

    # ---- pool1 (2x2 / 2) + channel/column re-layout for conv2 ---------------
    mw = jnp.maximum(a1[:, 0:111], a1[:, 1:112])           # width pairwise max (VPU)
    scr1[...] = mm(mw, s1_ref[...])                        # (BT*32, 56) -> VMEM
    n2 = n1 // 2
    p1 = jnp.maximum(scr1[pl.ds(0, n2, stride=2), :],      # height pairwise max via
                     scr1[pl.ds(1, n2, stride=2), :])      # stride-2 sublane loads
    p1 = p1 * mask_ref[...]         # zero the 2 pad/garbage rows of each 16-row band

    # ---- conv2 (4->8 ch, 3x3, pad 1) + ReLU ---------------------------------
    pm1 = pltpu.roll(p1, 1, axis=0)                        # [j] = p1[j-1]
    pp1 = pltpu.roll(p1, n2 - 1, axis=0)                   # [j] = p1[j+1]
    a2 = mm(pm1, t2_ref[0])
    a2 = a2 + mm(p1, t2_ref[1])
    a2 = a2 + mm(pp1, t2_ref[2])
    a2 = jnp.maximum(a2 + b2c_ref[...], 0.0)     # (BT*16, 112); band rows 0..13 valid

    # ---- pool2 + fc1 + ReLU --------------------------------------------------
    mw2 = jnp.maximum(a2[:, 0:111], a2[:, 1:112])
    scr2[...] = mm(mw2, s2_ref[...])                       # (BT*16, 56) -> VMEM
    bt = n2 // BAND2
    acc = b1f_ref[...]                                     # (1, 32), broadcasts
    for h in range(7):                                     # pooled row h of all images
        rows = jnp.maximum(scr2[pl.ds(2 * h, bt, stride=16), :],
                           scr2[pl.ds(2 * h + 1, bt, stride=16), :])   # (BT, 56)
        acc = acc + mm(rows, w1f_ref[h])                   # (BT, 56) @ (56, 32)
    hfc = jnp.maximum(acc, 0.0)                            # (BT, 32)

    # ---- fc2 -----------------------------------------------------------------
    out_ref[...] = mm(hfc, w2f_ref[...]) + b2f_ref[...]    # (BT, 10)


@jax.jit
def simple_cnn_forward(x, packed):
    t1, b1r, s1, t2, b2r, s2, w1p, b1fr, w2p, b2fr, mask = packed
    B = x.shape[0]
    bp = ((B + BT - 1) // BT) * BT
    x = x.reshape(B, 28, 28).astype(jnp.float32)
    if bp != B:
        x = jnp.concatenate([x, jnp.zeros((bp - B, 28, 28), jnp.float32)], axis=0)
    # Embed each image in a 32-row band: row 0 and rows 29..31 are the conv1 ky
    # zero padding / slack (band kept a multiple of 8 so stride-2 pooling gives
    # clean 16-row bands for conv2).
    xin = jnp.zeros((bp, BAND1, 28), jnp.float32).at[:, 1:29, :].set(x)
    xin = xin.reshape(bp * BAND1, 28)

    def const_spec(a):
        nd = a.ndim
        return pl.BlockSpec(a.shape, lambda b, _n=nd: (0,) * _n)

    out = pl.pallas_call(
        simple_cnn_kernel,
        out_shape=jax.ShapeDtypeStruct((bp, 10), jnp.float32),
        grid=(bp // BT,),
        in_specs=[
            pl.BlockSpec((BT * BAND1, 28), lambda b: (b, 0)),
            const_spec(mask), const_spec(t1), const_spec(b1r), const_spec(s1),
            const_spec(t2), const_spec(b2r), const_spec(s2),
            const_spec(w1p), const_spec(b1fr), const_spec(w2p), const_spec(b2fr),
        ],
        out_specs=pl.BlockSpec((BT, 10), lambda b: (b, 0)),
        scratch_shapes=[
            pltpu.VMEM((BT * BAND1, 56), jnp.float32),   # pool1 strided-read buffer
            pltpu.VMEM((BT * BAND2, 56), jnp.float32),   # pool2 strided-read buffer
        ],
        compiler_params=pltpu.CompilerParams(
            dimension_semantics=("parallel",)),
    )(xin, mask, t1, b1r, s1, t2, b2r, s2, w1p, b1fr, w2p, b2fr)
    return out[:B]


# ----------------------------------------------------------------------------
# Pure-JAX reference (raw PyTorch-layout params) for correctness check
# ----------------------------------------------------------------------------
def reference_forward(x, params):
    w1c, b1c, w2c, b2c, w1f, b1f, w2f, b2f = params

    def conv(z, w, b):
        y = lax.conv_general_dilated(z, w, (1, 1), ((1, 1), (1, 1)),
                                     dimension_numbers=('NCHW', 'OIHW', 'NCHW'))
        return jax.nn.relu(y + b[None, :, None, None])

    def pool(z):
        return lax.reduce_window(z, -jnp.inf, lax.max,
                                 (1, 1, 2, 2), (1, 1, 2, 2), 'VALID')

    y = pool(conv(x, w1c, b1c))
    y = pool(conv(y, w2c, b2c))
    y = y.reshape(y.shape[0], -1)
    y = jax.nn.relu(y @ w1f + b1f)
    return y @ w2f + b2f


if __name__ == "__main__":
    key = jax.random.PRNGKey(0)
    ks = jax.random.split(key, 9)

    # Input implied by the module: 1 channel, 28x28 (-> 7x7 after two pools).
    # B=16 gives a 2-step grid (BT=8) so both v7x TensorCores get work.
    B = 16
    x = jax.random.normal(ks[0], (B, 1, 28, 28), jnp.float32)

    # Deterministic synthetic parameters (shapes from SimpleCNN.__init__),
    # FC weights in (in, out) convention.
    w1c = jax.random.normal(ks[1], (4, 1, 3, 3), jnp.float32) * 0.3      # conv1
    b1c = jax.random.normal(ks[2], (4,), jnp.float32) * 0.1
    w2c = jax.random.normal(ks[3], (8, 4, 3, 3), jnp.float32) * 0.2      # conv2
    b2c = jax.random.normal(ks[4], (8,), jnp.float32) * 0.1
    w1f = jax.random.normal(ks[5], (8 * 7 * 7, 32), jnp.float32) * 0.05  # fc1
    b1f = jax.random.normal(ks[6], (32,), jnp.float32) * 0.1
    w2f = jax.random.normal(ks[7], (32, 10), jnp.float32) * 0.1          # fc2
    b2f = jax.random.normal(ks[8], (10,), jnp.float32) * 0.1
    params = (w1c, b1c, w2c, b2c, w1f, b1f, w2f, b2f)

    packed = pack_params(params)
    out = jax.block_until_ready(simple_cnn_forward(x, packed))
    assert out.shape == (B, 10)

    ref = reference_forward(x, params)
    # Tolerance is set for bf16 MXU operands with f32 accumulation (deliberate,
    # per perf review); genuine layout/selector/indexing bugs would produce
    # O(0.3+) errors and would still be caught.
    np.testing.assert_allclose(np.asarray(out), np.asarray(ref),
                               atol=4e-2, rtol=4e-2)
    print("KERNEL_OK")
</pallas_src>

<mosaic_0001>
module attributes {stable_mosaic.version = 11 : i64} {
  func.func @simple_cnn_kernel(%arg0: i32, %arg1: memref<256x28xf32, #tpu.memory_space<vmem>>, %arg2: memref<128x1xf32, #tpu.memory_space<vmem>>, %arg3: memref<3x28x112xbf16, #tpu.memory_space<vmem>>, %arg4: memref<1x112xf32, #tpu.memory_space<vmem>>, %arg5: memref<111x56xbf16, #tpu.memory_space<vmem>>, %arg6: memref<3x56x112xbf16, #tpu.memory_space<vmem>>, %arg7: memref<1x112xf32, #tpu.memory_space<vmem>>, %arg8: memref<111x56xbf16, #tpu.memory_space<vmem>>, %arg9: memref<7x56x32xbf16, #tpu.memory_space<vmem>>, %arg10: memref<1x32xf32, #tpu.memory_space<vmem>>, %arg11: memref<32x10xbf16, #tpu.memory_space<vmem>>, %arg12: memref<1x10xf32, #tpu.memory_space<vmem>>, %arg13: memref<8x10xf32, #tpu.memory_space<vmem>>, %arg14: memref<256x56xf32, #tpu.memory_space<vmem>>, %arg15: memref<128x56xf32, #tpu.memory_space<vmem>>) attributes {dimension_semantics = [#tpu.dimension_semantics<parallel>], iteration_bounds = array<i64: 2>, scalar_prefetch = 0 : i64, scratch_operands = 2 : i64, tpu.core_type = #tpu.core_type<tc>, window_params = [{transform_indices = @transform_0, window_bounds = array<i64: 256, 28>}, {pipeline_mode = #tpu.pipeline_mode<synchronous>, transform_indices = @transform_1, window_bounds = array<i64: 128, 1>}, {pipeline_mode = #tpu.pipeline_mode<synchronous>, transform_indices = @transform_2, window_bounds = array<i64: 3, 28, 112>}, {pipeline_mode = #tpu.pipeline_mode<synchronous>, transform_indices = @transform_3, window_bounds = array<i64: 1, 112>}, {pipeline_mode = #tpu.pipeline_mode<synchronous>, transform_indices = @transform_4, window_bounds = array<i64: 111, 56>}, {pipeline_mode = #tpu.pipeline_mode<synchronous>, transform_indices = @transform_5, window_bounds = array<i64: 3, 56, 112>}, {pipeline_mode = #tpu.pipeline_mode<synchronous>, transform_indices = @transform_6, window_bounds = array<i64: 1, 112>}, {pipeline_mode = #tpu.pipeline_mode<synchronous>, transform_indices = @transform_7, window_bounds = array<i64: 111, 56>}, {pipeline_mode = #tpu.pipeline_mode<synchronous>, transform_indices = @transform_8, window_bounds = array<i64: 7, 56, 32>}, {pipeline_mode = #tpu.pipeline_mode<synchronous>, transform_indices = @transform_9, window_bounds = array<i64: 1, 32>}, {pipeline_mode = #tpu.pipeline_mode<synchronous>, transform_indices = @transform_10, window_bounds = array<i64: 32, 10>}, {pipeline_mode = #tpu.pipeline_mode<synchronous>, transform_indices = @transform_11, window_bounds = array<i64: 1, 10>}, {transform_indices = @transform_12, window_bounds = array<i64: 8, 10>}]} {
    %c0 = arith.constant 0 : index
    %c0_0 = arith.constant 0 : index
    %0 = vector.load %arg1[%c0, %c0_0] : memref<256x28xf32, #tpu.memory_space<vmem>>, vector<256x28xf32>
    %c255_i32 = arith.constant 255 : i32
    %1 = tpu.dynamic_rotate %0 by %c255_i32 dim 0 : vector<256x28xf32>, i32 -> vector<256x28xf32>
    %c254_i32 = arith.constant 254 : i32
    %2 = tpu.dynamic_rotate %0 by %c254_i32 dim 0 : vector<256x28xf32>, i32 -> vector<256x28xf32>
    %c0_1 = arith.constant 0 : index
    %c0_2 = arith.constant 0 : index
    %c0_3 = arith.constant 0 : index
    %3 = vector.load %arg3[%c0_1, %c0_2, %c0_3] : memref<3x28x112xbf16, #tpu.memory_space<vmem>>, vector<1x28x112xbf16>
    %4 = vector.shape_cast %3 : vector<1x28x112xbf16> to vector<28x112xbf16>
    %5 = arith.truncf %0 : vector<256x28xf32> to vector<256x28xbf16>
    %cst = arith.constant dense<0.000000e+00> : vector<256x112xf32>
    %6 = tpu.matmul %5, %4, %cst {dimension_numbers = #tpu.dot_dimension_numbers<[1], [0], [0], [1], [0, 0, 1, 1], [], []>} : vector<256x28xbf16>, vector<28x112xbf16>, vector<256x112xf32> -> vector<256x112xf32>
    %c1 = arith.constant 1 : index
    %c0_4 = arith.constant 0 : index
    %c0_5 = arith.constant 0 : index
    %7 = vector.load %arg3[%c1, %c0_4, %c0_5] : memref<3x28x112xbf16, #tpu.memory_space<vmem>>, vector<1x28x112xbf16>
    %8 = vector.shape_cast %7 : vector<1x28x112xbf16> to vector<28x112xbf16>
    %9 = arith.truncf %1 : vector<256x28xf32> to vector<256x28xbf16>
    %cst_6 = arith.constant dense<0.000000e+00> : vector<256x112xf32>
    %10 = tpu.matmul %9, %8, %cst_6 {dimension_numbers = #tpu.dot_dimension_numbers<[1], [0], [0], [1], [0, 0, 1, 1], [], []>} : vector<256x28xbf16>, vector<28x112xbf16>, vector<256x112xf32> -> vector<256x112xf32>
    %11 = arith.addf %6, %10 : vector<256x112xf32>
    %c2 = arith.constant 2 : index
    %c0_7 = arith.constant 0 : index
    %c0_8 = arith.constant 0 : index
    %12 = vector.load %arg3[%c2, %c0_7, %c0_8] : memref<3x28x112xbf16, #tpu.memory_space<vmem>>, vector<1x28x112xbf16>
    %13 = vector.shape_cast %12 : vector<1x28x112xbf16> to vector<28x112xbf16>
    %14 = arith.truncf %2 : vector<256x28xf32> to vector<256x28xbf16>
    %cst_9 = arith.constant dense<0.000000e+00> : vector<256x112xf32>
    %15 = tpu.matmul %14, %13, %cst_9 {dimension_numbers = #tpu.dot_dimension_numbers<[1], [0], [0], [1], [0, 0, 1, 1], [], []>} : vector<256x28xbf16>, vector<28x112xbf16>, vector<256x112xf32> -> vector<256x112xf32>
    %16 = arith.addf %11, %15 : vector<256x112xf32>
    %c0_10 = arith.constant 0 : index
    %c0_11 = arith.constant 0 : index
    %17 = vector.load %arg4[%c0_10, %c0_11] : memref<1x112xf32, #tpu.memory_space<vmem>>, vector<1x112xf32>
    %18 = vector.broadcast %17 : vector<1x112xf32> to vector<256x112xf32>
    %19 = arith.addf %16, %18 : vector<256x112xf32>
    %cst_12 = arith.constant 0.000000e+00 : f32
    %20 = vector.broadcast %cst_12 : f32 to vector<256x112xf32>
    %21 = arith.maximumf %19, %20 : vector<256x112xf32>
    %22 = vector.extract_strided_slice %21 {offsets = [0, 0], sizes = [256, 111], strides = [1, 1]} : vector<256x112xf32> to vector<256x111xf32>
    %23 = vector.extract_strided_slice %21 {offsets = [0, 1], sizes = [256, 111], strides = [1, 1]} : vector<256x112xf32> to vector<256x111xf32>
    %24 = arith.maximumf %22, %23 : vector<256x111xf32>
    %c0_13 = arith.constant 0 : index
    %c0_14 = arith.constant 0 : index
    %25 = vector.load %arg5[%c0_13, %c0_14] : memref<111x56xbf16, #tpu.memory_space<vmem>>, vector<111x56xbf16>
    %26 = arith.truncf %24 : vector<256x111xf32> to vector<256x111xbf16>
    %cst_15 = arith.constant dense<0.000000e+00> : vector<256x56xf32>
    %27 = tpu.matmul %26, %25, %cst_15 {dimension_numbers = #tpu.dot_dimension_numbers<[1], [0], [0], [1], [0, 0, 1, 1], [], []>} : vector<256x111xbf16>, vector<111x56xbf16>, vector<256x56xf32> -> vector<256x56xf32>
    %c0_16 = arith.constant 0 : index
    %c0_17 = arith.constant 0 : index
    %28 = vector.load %arg14[%c0_16, %c0_17] : memref<256x56xf32, #tpu.memory_space<vmem>>, vector<256x56xf32>
    tpu.vector_store %arg14[%c0_16, %c0_17], %27 {strides = array<i32>} : memref<256x56xf32, #tpu.memory_space<vmem>>, vector<256x56xf32>,
    %c0_18 = arith.constant 0 : index
    %c0_19 = arith.constant 0 : index
    %29 = tpu.strided_load %arg14[%c0_18, %c0_19] {strides = array<i32: 2, 1>} : memref<256x56xf32, #tpu.memory_space<vmem>>, vector<128x56xf32>
    %c1_20 = arith.constant 1 : index
    %c0_21 = arith.constant 0 : index
    %30 = tpu.strided_load %arg14[%c1_20, %c0_21] {strides = array<i32: 2, 1>} : memref<256x56xf32, #tpu.memory_space<vmem>>, vector<128x56xf32>
    %31 = arith.maximumf %29, %30 : vector<128x56xf32>
    %c0_22 = arith.constant 0 : index
    %c0_23 = arith.constant 0 : index
    %32 = vector.load %arg2[%c0_22, %c0_23] : memref<128x1xf32, #tpu.memory_space<vmem>>, vector<128x1xf32>
    %33 = vector.broadcast %32 : vector<128x1xf32> to vector<128x56xf32>
    %34 = arith.mulf %31, %33 : vector<128x56xf32>
    %c1_i32 = arith.constant 1 : i32
    %35 = tpu.dynamic_rotate %34 by %c1_i32 dim 0 : vector<128x56xf32>, i32 -> vector<128x56xf32>
    %c127_i32 = arith.constant 127 : i32
    %36 = tpu.dynamic_rotate %34 by %c127_i32 dim 0 : vector<128x56xf32>, i32 -> vector<128x56xf32>
    %c0_24 = arith.constant 0 : index
    %c0_25 = arith.constant 0 : index
    %c0_26 = arith.constant 0 : index
    %37 = vector.load %arg6[%c0_24, %c0_25, %c0_26] : memref<3x56x112xbf16, #tpu.memory_space<vmem>>, vector<1x56x112xbf16>
    %38 = vector.shape_cast %37 : vector<1x56x112xbf16> to vector<56x112xbf16>
    %39 = arith.truncf %35 : vector<128x56xf32> to vector<128x56xbf16>
    %cst_27 = arith.constant dense<0.000000e+00> : vector<128x112xf32>
    %40 = tpu.matmul %39, %38, %cst_27 {dimension_numbers = #tpu.dot_dimension_numbers<[1], [0], [0], [1], [0, 0, 1, 1], [], []>} : vector<128x56xbf16>, vector<56x112xbf16>, vector<128x112xf32> -> vector<128x112xf32>
    %c1_28 = arith.constant 1 : index
    %c0_29 = arith.constant 0 : index
    %c0_30 = arith.constant 0 : index
    %41 = vector.load %arg6[%c1_28, %c0_29, %c0_30] : memref<3x56x112xbf16, #tpu.memory_space<vmem>>, vector<1x56x112xbf16>
    %42 = vector.shape_cast %41 : vector<1x56x112xbf16> to vector<56x112xbf16>
    %43 = arith.truncf %34 : vector<128x56xf32> to vector<128x56xbf16>
    %cst_31 = arith.constant dense<0.000000e+00> : vector<128x112xf32>
    %44 = tpu.matmul %43, %42, %cst_31 {dimension_numbers = #tpu.dot_dimension_numbers<[1], [0], [0], [1], [0, 0, 1, 1], [], []>} : vector<128x56xbf16>, vector<56x112xbf16>, vector<128x112xf32> -> vector<128x112xf32>
    %45 = arith.addf %40, %44 : vector<128x112xf32>
    %c2_32 = arith.constant 2 : index
    %c0_33 = arith.constant 0 : index
    %c0_34 = arith.constant 0 : index
    %46 = vector.load %arg6[%c2_32, %c0_33, %c0_34] : memref<3x56x112xbf16, #tpu.memory_space<vmem>>, vector<1x56x112xbf16>
    %47 = vector.shape_cast %46 : vector<1x56x112xbf16> to vector<56x112xbf16>
    %48 = arith.truncf %36 : vector<128x56xf32> to vector<128x56xbf16>
    %cst_35 = arith.constant dense<0.000000e+00> : vector<128x112xf32>
    %49 = tpu.matmul %48, %47, %cst_35 {dimension_numbers = #tpu.dot_dimension_numbers<[1], [0], [0], [1], [0, 0, 1, 1], [], []>} : vector<128x56xbf16>, vector<56x112xbf16>, vector<128x112xf32> -> vector<128x112xf32>
    %50 = arith.addf %45, %49 : vector<128x112xf32>
    %c0_36 = arith.constant 0 : index
    %c0_37 = arith.constant 0 : index
    %51 = vector.load %arg7[%c0_36, %c0_37] : memref<1x112xf32, #tpu.memory_space<vmem>>, vector<1x112xf32>
    %52 = vector.broadcast %51 : vector<1x112xf32> to vector<128x112xf32>
    %53 = arith.addf %50, %52 : vector<128x112xf32>
    %cst_38 = arith.constant 0.000000e+00 : f32
    %54 = vector.broadcast %cst_38 : f32 to vector<128x112xf32>
    %55 = arith.maximumf %53, %54 : vector<128x112xf32>
    %56 = vector.extract_strided_slice %55 {offsets = [0, 0], sizes = [128, 111], strides = [1, 1]} : vector<128x112xf32> to vector<128x111xf32>
    %57 = vector.extract_strided_slice %55 {offsets = [0, 1], sizes = [128, 111], strides = [1, 1]} : vector<128x112xf32> to vector<128x111xf32>
    %58 = arith.maximumf %56, %57 : vector<128x111xf32>
    %c0_39 = arith.constant 0 : index
    %c0_40 = arith.constant 0 : index
    %59 = vector.load %arg8[%c0_39, %c0_40] : memref<111x56xbf16, #tpu.memory_space<vmem>>, vector<111x56xbf16>
    %60 = arith.truncf %58 : vector<128x111xf32> to vector<128x111xbf16>
    %cst_41 = arith.constant dense<0.000000e+00> : vector<128x56xf32>
    %61 = tpu.matmul %60, %59, %cst_41 {dimension_numbers = #tpu.dot_dimension_numbers<[1], [0], [0], [1], [0, 0, 1, 1], [], []>} : vector<128x111xbf16>, vector<111x56xbf16>, vector<128x56xf32> -> vector<128x56xf32>
    %c0_42 = arith.constant 0 : index
    %c0_43 = arith.constant 0 : index
    %62 = vector.load %arg15[%c0_42, %c0_43] : memref<128x56xf32, #tpu.memory_space<vmem>>, vector<128x56xf32>
    tpu.vector_store %arg15[%c0_42, %c0_43], %61 {strides = array<i32>} : memref<128x56xf32, #tpu.memory_space<vmem>>, vector<128x56xf32>,
    %c0_44 = arith.constant 0 : index
    %c0_45 = arith.constant 0 : index
    %63 = vector.load %arg10[%c0_44, %c0_45] : memref<1x32xf32, #tpu.memory_space<vmem>>, vector<1x32xf32>
    %c0_46 = arith.constant 0 : index
    %c0_47 = arith.constant 0 : index
    %64 = tpu.strided_load %arg15[%c0_46, %c0_47] {strides = array<i32: 16, 1>} : memref<128x56xf32, #tpu.memory_space<vmem>>, vector<8x56xf32>
    %c1_48 = arith.constant 1 : index
    %c0_49 = arith.constant 0 : index
    %65 = tpu.strided_load %arg15[%c1_48, %c0_49] {strides = array<i32: 16, 1>} : memref<128x56xf32, #tpu.memory_space<vmem>>, vector<8x56xf32>
    %66 = arith.maximumf %64, %65 : vector<8x56xf32>
    %c0_50 = arith.constant 0 : index
    %c0_51 = arith.constant 0 : index
    %c0_52 = arith.constant 0 : index
    %67 = vector.load %arg9[%c0_50, %c0_51, %c0_52] : memref<7x56x32xbf16, #tpu.memory_space<vmem>>, vector<1x56x32xbf16>
    %68 = vector.shape_cast %67 : vector<1x56x32xbf16> to vector<56x32xbf16>
    %69 = arith.truncf %66 : vector<8x56xf32> to vector<8x56xbf16>
    %cst_53 = arith.constant dense<0.000000e+00> : vector<8x32xf32>
    %70 = tpu.matmul %69, %68, %cst_53 {dimension_numbers = #tpu.dot_dimension_numbers<[1], [0], [0], [1], [0, 0, 1, 1], [], []>} : vector<8x56xbf16>, vector<56x32xbf16>, vector<8x32xf32> -> vector<8x32xf32>
    %71 = vector.broadcast %63 : vector<1x32xf32> to vector<8x32xf32>
    %72 = arith.addf %71, %70 : vector<8x32xf32>
    %c2_54 = arith.constant 2 : index
    %c0_55 = arith.constant 0 : index
    %73 = tpu.strided_load %arg15[%c2_54, %c0_55] {strides = array<i32: 16, 1>} : memref<128x56xf32, #tpu.memory_space<vmem>>, vector<8x56xf32>
    %c3 = arith.constant 3 : index
    %c0_56 = arith.constant 0 : index
    %74 = tpu.strided_load %arg15[%c3, %c0_56] {strides = array<i32: 16, 1>} : memref<128x56xf32, #tpu.memory_space<vmem>>, vector<8x56xf32>
    %75 = arith.maximumf %73, %74 : vector<8x56xf32>
    %c1_57 = arith.constant 1 : index
    %c0_58 = arith.constant 0 : index
    %c0_59 = arith.constant 0 : index
    %76 = vector.load %arg9[%c1_57, %c0_58, %c0_59] : memref<7x56x32xbf16, #tpu.memory_space<vmem>>, vector<1x56x32xbf16>
    %77 = vector.shape_cast %76 : vector<1x56x32xbf16> to vector<56x32xbf16>
    %78 = arith.truncf %75 : vector<8x56xf32> to vector<8x56xbf16>
    %cst_60 = arith.constant dense<0.000000e+00> : vector<8x32xf32>
    %79 = tpu.matmul %78, %77, %cst_60 {dimension_numbers = #tpu.dot_dimension_numbers<[1], [0], [0], [1], [0, 0, 1, 1], [], []>} : vector<8x56xbf16>, vector<56x32xbf16>, vector<8x32xf32> -> vector<8x32xf32>
    %80 = arith.addf %72, %79 : vector<8x32xf32>
    %c4 = arith.constant 4 : index
    %c0_61 = arith.constant 0 : index
    %81 = tpu.strided_load %arg15[%c4, %c0_61] {strides = array<i32: 16, 1>} : memref<128x56xf32, #tpu.memory_space<vmem>>, vector<8x56xf32>
    %c5 = arith.constant 5 : index
    %c0_62 = arith.constant 0 : index
    %82 = tpu.strided_load %arg15[%c5, %c0_62] {strides = array<i32: 16, 1>} : memref<128x56xf32, #tpu.memory_space<vmem>>, vector<8x56xf32>
    %83 = arith.maximumf %81, %82 : vector<8x56xf32>
    %c2_63 = arith.constant 2 : index
    %c0_64 = arith.constant 0 : index
    %c0_65 = arith.constant 0 : index
    %84 = vector.load %arg9[%c2_63, %c0_64, %c0_65] : memref<7x56x32xbf16, #tpu.memory_space<vmem>>, vector<1x56x32xbf16>
    %85 = vector.shape_cast %84 : vector<1x56x32xbf16> to vector<56x32xbf16>
    %86 = arith.truncf %83 : vector<8x56xf32> to vector<8x56xbf16>
    %cst_66 = arith.constant dense<0.000000e+00> : vector<8x32xf32>
    %87 = tpu.matmul %86, %85, %cst_66 {dimension_numbers = #tpu.dot_dimension_numbers<[1], [0], [0], [1], [0, 0, 1, 1], [], []>} : vector<8x56xbf16>, vector<56x32xbf16>, vector<8x32xf32> -> vector<8x32xf32>
    %88 = arith.addf %80, %87 : vector<8x32xf32>
    %c6 = arith.constant 6 : index
    %c0_67 = arith.constant 0 : index
    %89 = tpu.strided_load %arg15[%c6, %c0_67] {strides = array<i32: 16, 1>} : memref<128x56xf32, #tpu.memory_space<vmem>>, vector<8x56xf32>
    %c7 = arith.constant 7 : index
    %c0_68 = arith.constant 0 : index
    %90 = tpu.strided_load %arg15[%c7, %c0_68] {strides = array<i32: 16, 1>} : memref<128x56xf32, #tpu.memory_space<vmem>>, vector<8x56xf32>
    %91 = arith.maximumf %89, %90 : vector<8x56xf32>
    %c3_69 = arith.constant 3 : index
    %c0_70 = arith.constant 0 : index
    %c0_71 = arith.constant 0 : index
    %92 = vector.load %arg9[%c3_69, %c0_70, %c0_71] : memref<7x56x32xbf16, #tpu.memory_space<vmem>>, vector<1x56x32xbf16>
    %93 = vector.shape_cast %92 : vector<1x56x32xbf16> to vector<56x32xbf16>
    %94 = arith.truncf %91 : vector<8x56xf32> to vector<8x56xbf16>
    %cst_72 = arith.constant dense<0.000000e+00> : vector<8x32xf32>
    %95 = tpu.matmul %94, %93, %cst_72 {dimension_numbers = #tpu.dot_dimension_numbers<[1], [0], [0], [1], [0, 0, 1, 1], [], []>} : vector<8x56xbf16>, vector<56x32xbf16>, vector<8x32xf32> -> vector<8x32xf32>
    %96 = arith.addf %88, %95 : vector<8x32xf32>
    %c8 = arith.constant 8 : index
    %c0_73 = arith.constant 0 : index
    %97 = tpu.strided_load %arg15[%c8, %c0_73] {strides = array<i32: 16, 1>} : memref<128x56xf32, #tpu.memory_space<vmem>>, vector<8x56xf32>
    %c9 = arith.constant 9 : index
    %c0_74 = arith.constant 0 : index
    %98 = tpu.strided_load %arg15[%c9, %c0_74] {strides = array<i32: 16, 1>} : memref<128x56xf32, #tpu.memory_space<vmem>>, vector<8x56xf32>
    %99 = arith.maximumf %97, %98 : vector<8x56xf32>
    %c4_75 = arith.constant 4 : index
    %c0_76 = arith.constant 0 : index
    %c0_77 = arith.constant 0 : index
    %100 = vector.load %arg9[%c4_75, %c0_76, %c0_77] : memref<7x56x32xbf16, #tpu.memory_space<vmem>>, vector<1x56x32xbf16>
    %101 = vector.shape_cast %100 : vector<1x56x32xbf16> to vector<56x32xbf16>
    %102 = arith.truncf %99 : vector<8x56xf32> to vector<8x56xbf16>
    %cst_78 = arith.constant dense<0.000000e+00> : vector<8x32xf32>
    %103 = tpu.matmul %102, %101, %cst_78 {dimension_numbers = #tpu.dot_dimension_numbers<[1], [0], [0], [1], [0, 0, 1, 1], [], []>} : vector<8x56xbf16>, vector<56x32xbf16>, vector<8x32xf32> -> vector<8x32xf32>
    %104 = arith.addf %96, %103 : vector<8x32xf32>
    %c10 = arith.constant 10 : index
    %c0_79 = arith.constant 0 : index
    %105 = tpu.strided_load %arg15[%c10, %c0_79] {strides = array<i32: 16, 1>} : memref<128x56xf32, #tpu.memory_space<vmem>>, vector<8x56xf32>
    %c11 = arith.constant 11 : index
    %c0_80 = arith.constant 0 : index
    %106 = tpu.strided_load %arg15[%c11, %c0_80] {strides = array<i32: 16, 1>} : memref<128x56xf32, #tpu.memory_space<vmem>>, vector<8x56xf32>
    %107 = arith.maximumf %105, %106 : vector<8x56xf32>
    %c5_81 = arith.constant 5 : index
    %c0_82 = arith.constant 0 : index
    %c0_83 = arith.constant 0 : index
    %108 = vector.load %arg9[%c5_81, %c0_82, %c0_83] : memref<7x56x32xbf16, #tpu.memory_space<vmem>>, vector<1x56x32xbf16>
    %109 = vector.shape_cast %108 : vector<1x56x32xbf16> to vector<56x32xbf16>
    %110 = arith.truncf %107 : vector<8x56xf32> to vector<8x56xbf16>
    %cst_84 = arith.constant dense<0.000000e+00> : vector<8x32xf32>
    %111 = tpu.matmul %110, %109, %cst_84 {dimension_numbers = #tpu.dot_dimension_numbers<[1], [0], [0], [1], [0, 0, 1, 1], [], []>} : vector<8x56xbf16>, vector<56x32xbf16>, vector<8x32xf32> -> vector<8x32xf32>
    %112 = arith.addf %104, %111 : vector<8x32xf32>
    %c12 = arith.constant 12 : index
    %c0_85 = arith.constant 0 : index
    %113 = tpu.strided_load %arg15[%c12, %c0_85] {strides = array<i32: 16, 1>} : memref<128x56xf32, #tpu.memory_space<vmem>>, vector<8x56xf32>
    %c13 = arith.constant 13 : index
    %c0_86 = arith.constant 0 : index
    %114 = tpu.strided_load %arg15[%c13, %c0_86] {strides = array<i32: 16, 1>} : memref<128x56xf32, #tpu.memory_space<vmem>>, vector<8x56xf32>
    %115 = arith.maximumf %113, %114 : vector<8x56xf32>
    %c6_87 = arith.constant 6 : index
    %c0_88 = arith.constant 0 : index
    %c0_89 = arith.constant 0 : index
    %116 = vector.load %arg9[%c6_87, %c0_88, %c0_89] : memref<7x56x32xbf16, #tpu.memory_space<vmem>>, vector<1x56x32xbf16>
    %117 = vector.shape_cast %116 : vector<1x56x32xbf16> to vector<56x32xbf16>
    %118 = arith.truncf %115 : vector<8x56xf32> to vector<8x56xbf16>
    %cst_90 = arith.constant dense<0.000000e+00> : vector<8x32xf32>
    %119 = tpu.matmul %118, %117, %cst_90 {dimension_numbers = #tpu.dot_dimension_numbers<[1], [0], [0], [1], [0, 0, 1, 1], [], []>} : vector<8x56xbf16>, vector<56x32xbf16>, vector<8x32xf32> -> vector<8x32xf32>
    %120 = arith.addf %112, %119 : vector<8x32xf32>
    %cst_91 = arith.constant 0.000000e+00 : f32
    %121 = vector.broadcast %cst_91 : f32 to vector<8x32xf32>
    %122 = arith.maximumf %120, %121 : vector<8x32xf32>
    %c0_92 = arith.constant 0 : index
    %c0_93 = arith.constant 0 : index
    %123 = vector.load %arg11[%c0_92, %c0_93] : memref<32x10xbf16, #tpu.memory_space<vmem>>, vector<32x10xbf16>
    %124 = arith.truncf %122 : vector<8x32xf32> to vector<8x32xbf16>
    %cst_94 = arith.constant dense<0.000000e+00> : vector<8x10xf32>
    %125 = tpu.matmul %124, %123, %cst_94 {dimension_numbers = #tpu.dot_dimension_numbers<[1], [0], [0], [1], [0, 0, 1, 1], [], []>} : vector<8x32xbf16>, vector<32x10xbf16>, vector<8x10xf32> -> vector<8x10xf32>
    %c0_95 = arith.constant 0 : index
    %c0_96 = arith.constant 0 : index
    %126 = vector.load %arg12[%c0_95, %c0_96] : memref<1x10xf32, #tpu.memory_space<vmem>>, vector<1x10xf32>
    %127 = vector.broadcast %126 : vector<1x10xf32> to vector<8x10xf32>
    %128 = arith.addf %125, %127 : vector<8x10xf32>
    %c0_97 = arith.constant 0 : index
    %c0_98 = arith.constant 0 : index
    %129 = vector.load %arg13[%c0_97, %c0_98] : memref<8x10xf32, #tpu.memory_space<vmem>>, vector<8x10xf32>
    tpu.vector_store %arg13[%c0_97, %c0_98], %128 {strides = array<i32>} : memref<8x10xf32, #tpu.memory_space<vmem>>, vector<8x10xf32>,
    return
  }
  func.func @transform_0(%arg0: i32) -> (i32, i32) {
    %c0_i32 = arith.constant 0 : i32
    %c0_i32_0 = arith.constant 0 : i32
    return %arg0, %c0_i32 : i32, i32
  }
  func.func @transform_1(%arg0: i32) -> (i32, i32) {
    %c0_i32 = arith.constant 0 : i32
    %c0_i32_0 = arith.constant 0 : i32
    %c0_i32_1 = arith.constant 0 : i32
    return %c0_i32, %c0_i32_0 : i32, i32
  }
  func.func @transform_2(%arg0: i32) -> (i32, i32, i32) {
    %c0_i32 = arith.constant 0 : i32
    %c0_i32_0 = arith.constant 0 : i32
    %c0_i32_1 = arith.constant 0 : i32
    %c0_i32_2 = arith.constant 0 : i32
    return %c0_i32, %c0_i32_0, %c0_i32_1 : i32, i32, i32
  }
  func.func @transform_3(%arg0: i32) -> (i32, i32) {
    %c0_i32 = arith.constant 0 : i32
    %c0_i32_0 = arith.constant 0 : i32
    %c0_i32_1 = arith.constant 0 : i32
    return %c0_i32, %c0_i32_0 : i32, i32
  }
  func.func @transform_4(%arg0: i32) -> (i32, i32) {
    %c0_i32 = arith.constant 0 : i32
    %c0_i32_0 = arith.constant 0 : i32
    %c0_i32_1 = arith.constant 0 : i32
    return %c0_i32, %c0_i32_0 : i32, i32
  }
  func.func @transform_5(%arg0: i32) -> (i32, i32, i32) {
    %c0_i32 = arith.constant 0 : i32
    %c0_i32_0 = arith.constant 0 : i32
    %c0_i32_1 = arith.constant 0 : i32
    %c0_i32_2 = arith.constant 0 : i32
    return %c0_i32, %c0_i32_0, %c0_i32_1 : i32, i32, i32
  }
  func.func @transform_6(%arg0: i32) -> (i32, i32) {
    %c0_i32 = arith.constant 0 : i32
    %c0_i32_0 = arith.constant 0 : i32
    %c0_i32_1 = arith.constant 0 : i32
    return %c0_i32, %c0_i32_0 : i32, i32
  }
  func.func @transform_7(%arg0: i32) -> (i32, i32) {
    %c0_i32 = arith.constant 0 : i32
    %c0_i32_0 = arith.constant 0 : i32
    %c0_i32_1 = arith.constant 0 : i32
    return %c0_i32, %c0_i32_0 : i32, i32
  }
  func.func @transform_8(%arg0: i32) -> (i32, i32, i32) {
    %c0_i32 = arith.constant 0 : i32
    %c0_i32_0 = arith.constant 0 : i32
    %c0_i32_1 = arith.constant 0 : i32
    %c0_i32_2 = arith.constant 0 : i32
    return %c0_i32, %c0_i32_0, %c0_i32_1 : i32, i32, i32
  }
  func.func @transform_9(%arg0: i32) -> (i32, i32) {
    %c0_i32 = arith.constant 0 : i32
    %c0_i32_0 = arith.constant 0 : i32
    %c0_i32_1 = arith.constant 0 : i32
    return %c0_i32, %c0_i32_0 : i32, i32
  }
  func.func @transform_10(%arg0: i32) -> (i32, i32) {
    %c0_i32 = arith.constant 0 : i32
    %c0_i32_0 = arith.constant 0 : i32
    %c0_i32_1 = arith.constant 0 : i32
    return %c0_i32, %c0_i32_0 : i32, i32
  }
  func.func @transform_11(%arg0: i32) -> (i32, i32) {
    %c0_i32 = arith.constant 0 : i32
    %c0_i32_0 = arith.constant 0 : i32
    %c0_i32_1 = arith.constant 0 : i32
    return %c0_i32, %c0_i32_0 : i32, i32
  }
  func.func @transform_12(%arg0: i32) -> (i32, i32) {
    %c0_i32 = arith.constant 0 : i32
    %c0_i32_0 = arith.constant 0 : i32
    return %arg0, %c0_i32 : i32, i32
  }
}

</mosaic_0001>

<bundles_post_ra>
// kernel: simple_cnn_forward.1
= control target key start
LH: loop header
LB: loop body
LE: loop exit
PB: predicated region body
PF: predicated region fallthrough
CT: control target
= control target key end

     0   :  { %s6928_s0 = inlined_call_operand.vmem [shape: f32[512,28], index: 0, kind: input, shape index: {}]   ;;  %s6929_s1 = inlined_call_operand.vmem [shape: f32[128,1], index: 1, kind: input, shape index: {}]   ;;  %s6930_s2 = inlined_call_operand.vmem [shape: bf16[3,28,112], index: 2, kind: input, shape index: {}]   ;;  %s6931_s3 = inlined_call_operand.vmem [shape: f32[1,112], index: 3, kind: input, shape index: {}]   ;;  %s6932_s4 = inlined_call_operand.vmem [shape: bf16[111,56], index: 4, kind: input, shape index: {}]   ;;  %s6933_s5 = inlined_call_operand.vmem [shape: bf16[3,56,112], index: 5, kind: input, shape index: {}]   ;;  %s6934_s6 = inlined_call_operand.vmem [shape: f32[1,112], index: 6, kind: input, shape index: {}]   ;;  %s6935_s7 = inlined_call_operand.vmem [shape: bf16[111,56], index: 7, kind: input, shape index: {}]   ;;  %s6936_s8 = inlined_call_operand.vmem [shape: bf16[7,56,32], index: 8, kind: input, shape index: {}]   ;;  %s6937_s9 = inlined_call_operand.vmem [shape: f32[1,32], index: 9, kind: input, shape index: {}]   ;;  %s6938_s10 = inlined_call_operand.vmem [shape: bf16[32,10], index: 10, kind: input, shape index: {}]   ;;  %s6939_s11 = inlined_call_operand.vmem [shape: f32[1,10], index: 11, kind: input, shape index: {}]   ;;  %s6940_s12 = inlined_call_operand.hbm [shape: f32[16,10], index: 12, kind: output, shape index: {}]  }
   0x1   :  { %6960 = sst [smem:[#allocation7_spill]] %s6928_s0 }
   0x2   :  { %17 = vsyncpa [#allocation5], 0 }
   0x3   :  { %19 = vsyncpa [#allocation5 + $0x1], 0  ;;  %s5034_s21 = smov 0   ;;  %s5036_s22 = smov 0  }
   0x4   :  { %s5038_s23 = smov 0   ;;  %s5040_s24 = smov 0  }
   0x5 LB: > { %s5055_s25 = sadd.s32 4294967295, %s4961_s24   ;;  %s3780_s26 = sadd.s32 4294967294, %s4961_s24   ;;  %s4961_s24 = sphi %s5040_s24, %s7053_s24   ;;  %s4957_s23 = sphi %s5038_s23, %s7052_s23   ;;  %s4953_s22 = sphi %s5036_s22, %s7051_s22   ;;  %s4949_s21 = sphi %s5034_s21, %s7050_s21  }
   0x6   : > { %s5059_s27 = sadd.s32 1, %s4961_s24   ;;  %s289_s28 = sadd.s32 1, %s4957_s23 }
   0x7   : > { %s286_s29 = ssub.s32 %s4961_s24, %s5059_s27  ;;  %p299_p0 = scmp.ne.s32.totalorder %s4957_s23, %s4953_s22 }
   0x8   : > { %p287_p1 = scmp.eq.s32.totalorder %s286_s29, 0  ;;  %p300_p2 = scmp.eq.s32.totalorder %s5055_s25, 1 }
   0x9   : > { %p305_p3 = scmp.ne.s32.totalorder %s4953_s22, %s4949_s21  ;;  %p306_p4 = scmp.eq.s32.totalorder %s3780_s26, 1 }
   0xa   : > { %s5070_s30 = scalar_select %p287_p1, %s4957_s23, %s289_s28  }
   0xb   : > { %p5072_p5 = por %p300_p2, %p299_p0  ;;  %p5076_p6 = por %p306_p4, %p305_p3 }
   0xc   : > { %p3783_p7 = scmp.ge.s32.totalorder %s4961_s24, 1  ;;  %p366_p8 = scmp.lt.s32.totalorder %s4961_s24, 3 }
   0xe   : > { %p367_p9 = pnand %p3783_p7, %p366_p8 }
   0xf   : > { %v4837_v0 = vld [vmem:[%s6930_s2 + $0x10] sm:$0xff] (!%p367_p9)   ;;  %vm680_vm0 = vcmask (!%p367_p9), 1045504   ;;  %v4838_v1 = vld [vmem:[%s6930_s2 + $0x18] sm:$0x3f] (!%p367_p9)   ;;  %v479_v2 = vlaneseq (!%p367_p9)  ;;  %s3785_s19 = sshll.u32 (!%p367_p9), %s5055_s25, 5  ;;  %v4839_v4 = vld [vmem:[%s6930_s2] sm:$0xff] (!%p367_p9)  }
  0x10   : > { %370 = sbr.rel (%p367_p9) target bundleno = 1920 (0x780), region = 68  ;;  %4191 = vmatprep.subr.bf16.mxu0 (!%p367_p9), %v4837_v0  ;;  %4539 = vmatprep.subr.bf16.mxu1 (!%p367_p9), %v4837_v0  ;;  %p409_p10 = scmp.lt.s32.totalorder (!%p367_p9), %s3785_s19, 63  ;;  %v682_v3 = vsel (!%p367_p9), %vm680_vm0, %v4838_v1, 0  ;;  %vm631_vm3 = vcmask (!%p367_p9), 228352   ;;  %v4840_v30 = vld [vmem:[%s6930_s2 + $0x8] sm:$0x3f] (!%p367_p9)  }
  0x11   : > { %4192 = vmatpush3.bf16.msra.mxu0 (!%p367_p9), %v4837_v0  ;;  %4541 = vmatpush3.bf16.msra.mxu1 (!%p367_p9), %v4837_v0  ;;  %v5095_v5 = vshrl.u32 (!%p367_p9), %v479_v2, 7  ;;  %s6963_s0 = sld [smem:[#allocation7_spill]] (!%p367_p9)  ;;  %v5169_v35 = vld [vmem:[%s6930_s2 + $0x28] sm:$0x3f] (!%p367_p9)   ;;  %v905_v40 = vsel (!%p367_p9), %vm680_vm0, %v4840_v30, 0  ;;  %v5184_v41 = vld [vmem:[%s6930_s2 + $0x20] sm:$0xff] (!%p367_p9)  }
  0x12   : > { %4664 = vmatprep.subr.msk.bf16.mxu0 (!%p367_p9), %vm680_vm0, %v4838_v1  ;;  %4665 = vmatprep.subr.msk.bf16.mxu1 (!%p367_p9), %vm680_vm0, %v4838_v1  ;;  %v5209_v50 = vsel (!%p367_p9), %vm680_vm0, %v5169_v35, 0  ;;  %vm1695_vm4 = vcmask (!%p367_p9), 1046528   ;;  %vm1696_vm5 = vcmask (!%p367_p9), 1047552   ;;  %s6952_s26 = smov (!%p367_p9), 127   ;;  %vm1646_vm6 = vcmask (!%p367_p9), 908288   ;;  %s7049_s15 = smov (!%p367_p9), 127  }
  0x13   : > { %vm481_vm1 = vcmp.lt.s32.totalorder (!%p367_p9), %v5095_v5, 7  ;;  %vm546_vm2 = vcmp.lt.s32.totalorder (!%p367_p9), %v5095_v5, 6  ;;  %vm2228_vm7 = vcmask (!%p367_p9), 1043456   ;;  %vm1863_vm8 = vcmask (!%p367_p9), 457728   ;;  %s405_s18 = sand.u32 (!%p367_p9), 1, %s4953_s22   ;;  %s4968_s20 = smov (!%p367_p9), [#allocation4]  }
  0x14   : > { %vm2103_vm9 = vcmp.lt.s32.totalorder (!%p367_p9), %v5095_v5, 1  ;;  %v4865_v5 = vld [vmem:[%s6935_s7 + $0x18] sm:$0xff] (!%p367_p9)   ;;  %vm4967_vm10 = vmmov (!%p367_p9), 0   ;;  %vm3661_vm11 = vcmask (!%p367_p9), 261120   ;;  %vm3705_vm12 = vcmask (!%p367_p9), 80896  }
  0x15   : > { %4194 = vmatpush3.bf16.msra.mxu0 (!%p367_p9), %v682_v3  ;;  %4542 = vmatpush3.bf16.msra.mxu1 (!%p367_p9), %v682_v3 }
  0x16   : > { %4227 = vmatprep.subr.bf16.mxu0 (!%p367_p9), %v4839_v4 }
  0x17   : > { %s7055_s19 = smov (!%p409_p10, %s3785_s19), 63 }
  0x18   : > { %s3786_s28 = sshll.u32 %s7055_s19, 3  ;;  %s3784_s19 = sshll.u32 %s405_s18, 3 }
  0x19   : > { %s5100_s16 = scalar_lea.vmem %s6963_s0, %s3786_s28  ;;  %s407_s28 = scalar_lea.vmem [#allocation4], %s3784_s19 }
  0x1a   : > { %v5103_v6 = vld [vmem:[%s5100_s16] sm:$0xff]  ;;  %v5106_v7 = vld [vmem:[%s5100_s16 + $0x8] sm:$0xff]  ;;  %v5109_v8 = vld [vmem:[%s5100_s16 + $0x10] sm:$0xff]  ;;  %s3721_s29 = sshll.u32 %s407_s28, 4  ;;  %s4903_s0 = sshll.u32 %s4968_s20, 4  ;;  %s6888_s29 = int_to_ptr.vmem [resolvable:$true] %s3721_s29  ;;  %s4904_s0 = int_to_ptr.vmem [resolvable:$false] %s4903_s0 }
  0x1b   : > { %v5113_v9 = vld [vmem:[%s5100_s16 + $0x18] sm:$0xff]  ;;  %v6941_v10 = vrot.slane %v5103_v6, 1  ;;  %v448_v11 = vrot.slane %v5106_v7, 1  ;;  %v449_v12 = vrot.slane %v5109_v8, 1  ;;  %v5120_v13 = vld [vmem:[%s5100_s16 + $0x20] sm:$0xff]  ;;  %v516_v14 = vrot.slane %v5109_v8, 2  ;;  %p4906_p0 = scmp.lt.s32.totalorder %s6888_s29, %s4904_s0 }
  0x1c   : > { %v517_v15 = vrot.slane %v5113_v9, 2  ;;  %v5125_v16 = vld [vmem:[%s5100_s16 + $0x28] sm:$0xff]  ;;  %v5128_v17 = vld [vmem:[%s5100_s16 + $0x30] sm:$0xff]  ;;  %v5131_v18 = vld [vmem:[%s5100_s16 + $0x38] sm:$0xff]  ;;  %v450_v21 = vrot.slane %v5113_v9, 1  ;;  %v451_v22 = vrot.slane %v5120_v13, 1  ;;  %v584_v46 = vpack.c.bf16 %v5113_v9, %v5109_v8 }
  0x1d   : > { %v511_v19 = vsel %vm481_vm1, %v448_v11, %v449_v12  ;;  %v512_v20 = vsel %vm481_vm1, %v6941_v10, %v448_v11  ;;  %v5142_v23 = vld [vmem:[%s5100_s16 + $0x40] sm:$0xff]  ;;  %v452_v26 = vrot.slane %v5125_v16, 1  ;;  %v453_v29 = vrot.slane %v5128_v17, 1  ;;  %v5187_v42 = vld [vmem:[%s5100_s16 + $0x48] sm:$0xff]  ;;  %v5190_v43 = vld [vmem:[%s5100_s16 + $0x50] sm:$0xff]  ;;  %s4899_s19 = scalar_lea.vmem %s6888_s29, 128 }
  0x1e   : > { %v5150_v24 = vsel %vm546_vm2, %v516_v14, %v517_v15  ;;  %v604_v25 = vpack.c.bf16 %v511_v19, %v512_v20  ;;  %v509_v27 = vsel %vm481_vm1, %v450_v21, %v451_v22  ;;  %v510_v28 = vsel %vm481_vm1, %v449_v12, %v450_v21  ;;  %v5199_v47 = vld [vmem:[%s5100_s16 + $0x58] sm:$0xff]  ;;  %v5202_v48 = vld [vmem:[%s5100_s16 + $0x60] sm:$0xff]  ;;  %v5205_v49 = vld [vmem:[%s5100_s16 + $0x68] sm:$0xff]  ;;  %p4900_p11 = scmp.ne.s32.totalorder %s6888_s29, %s4899_s19 }
  0x1f   : > { %v454_v31 = vrot.slane %v5131_v18, 1  ;;  %v605_v32 = vpack.c.bf16 %v509_v27, %v510_v28  ;;  %v508_v33 = vsel %vm481_vm1, %v451_v22, %v452_v26  ;;  %v455_v34 = vrot.slane %v5142_v23, 1  ;;  %v5219_v55 = vld [vmem:[%s5100_s16 + $0x70] sm:$0xff]  ;;  %v5222_v56 = vld [vmem:[%s5100_s16 + $0x78] sm:$0xff]  ;;  %v5228_v61 = vld [vmem:[%s5100_s16 + $0x80] sm:$0xff] }
  0x20   : > { %4195 = vmatprep.mubr.msk.bf16.mxu0 %vm631_vm3, %v604_v25  ;;  %v507_v36 = vsel %vm481_vm1, %v452_v26, %v453_v29  ;;  %v6942_v44 = vrot.slane %v5103_v6, 2  ;;  %v515_v45 = vrot.slane %v5106_v7, 2  ;;  %v518_v51 = vrot.slane %v5120_v13, 2  ;;  %v5231_v62 = vld [vmem:[%s5100_s16 + $0x88] sm:$0xff]  ;;  %v5238_v3 = vld [vmem:[%s5100_s16 + $0x90] sm:$0xff]  ;;  %v5249_v21 = vld [vmem:[%s5100_s16 + $0xa0] sm:$0xff]  ;;  %p4901_p12 = pnand %p4900_p11, %p5072_p5 }
  0x21   : > { %4196 = vmatmul.mubr.msk.bf16.vlgmr.msra.gmra.mrb[0].mxu0 %vm631_vm3, %v605_v32  ;;  %v606_v37 = vpack.c.bf16 %v507_v36, %v508_v33  ;;  %v505_v38 = vsel %vm481_vm1, %v454_v31, %v455_v34  ;;  %v506_v39 = vsel %vm481_vm1, %v453_v29, %v454_v31  ;;  %v583_v52 = vpack.c.bf16 %v5106_v7, %v5103_v6  ;;  %v5252_v22 = vld [vmem:[%s5100_s16 + $0xa8] sm:$0xff]  ;;  %v5259_v29 = vld [vmem:[%s5100_s16 + $0xb0] sm:$0xff]  ;;  %v5284_v31 = vld [vmem:[%s5100_s16 + $0xd8] sm:$0xff] }
  0x22   : > { %4228 = vmatpush3.bf16.msra.mxu0 %v4839_v4  ;;  %v585_v53 = vpack.c.bf16 %v5125_v16, %v5120_v13  ;;  %v607_v57 = vpack.c.bf16 %v505_v38, %v506_v39  ;;  %v523_v58 = vrot.slane %v5187_v42, 2  ;;  %v458_v59 = vrot.slane %v5199_v47, 1  ;;  %v5241_v4 = vld [vmem:[%s5100_s16 + $0x98] sm:$0xff]  ;;  %v5273_v38 = vld [vmem:[%s5100_s16 + $0xc8] sm:$0xff]  ;;  %v5281_v33 = vld [vmem:[%s5100_s16 + $0xd0] sm:$0xff]  ;;  %p4902_p13 = pneg %p4901_p12 }
  0x23   : > { %4199 = vmatprep.mubr.msk.bf16.mxu0 %vm631_vm3, %v606_v37  ;;  %4666 = vmatprep.subr.msk.bf16.mxu0 %vm680_vm0, %v4840_v30  ;;  %v524_v60 = vrot.slane %v5190_v43, 2  ;;  %v525_v63 = vrot.slane %v5199_v47, 2  ;;  %v459_v0 = vrot.slane %v5202_v48, 1  ;;  %v460_v1 = vrot.slane %v5205_v49, 1  ;;  %v5262_v30 = vld [vmem:[%s5100_s16 + $0xb8] sm:$0xff]  ;;  %v5270_v37 = vld [vmem:[%s5100_s16 + $0xc0] sm:$0xff] }
  0x24   : > { %v526_v2 = vrot.slane %v5202_v48, 2  ;;  %v461_v12 = vrot.slane %v5219_v55, 1  ;;  %v463_v26 = vrot.slane %v5228_v61, 1  ;;  %v5291_v25 = vld [vmem:[%s5100_s16 + $0xe0] sm:$0xff]  ;;  %v5294_v39 = vld [vmem:[%s5100_s16 + $0xe8] sm:$0xff]  ;;  %v540_v54 = vrot.slane %v5281_v33, 2 }
  0x25   : > { %v541_v11 = vrot.slane %v5284_v31, 2  ;;  %v542_v20 = vrot.slane %v5291_v25, 2  ;;  %v587_v36 = vpack.c.bf16 %v5187_v42, %v5142_v23  ;;  %v5332_v19 = vsel %vm546_vm2, %v6942_v44, %v515_v45 }
  0x26   : > { %4230 = vmatpush3.bf16.msra.mxu0 %v905_v40  ;;  %v5297_v40 = vld [vmem:[%s5100_s16 + $0xf0] sm:$0xff]  ;;  %v5340_v32 = vsel %vm546_vm2, %v517_v15, %v518_v51  ;;  %v519_v27 = vrot.slane %v5125_v16, 2  ;;  %v521_v44 = vrot.slane %v5131_v18, 2  ;;  %v522_v15 = vrot.slane %v5142_v23, 2 }
  0x27   : > { %4263 = vmatprep.subr.bf16.mxu0 %v5184_v41  ;;  %v477_v10 = vrot.slane %v5297_v40, 1 }
  0x28   : > { %v5367_v9 = vsel %vm546_vm2, %v518_v51, %v519_v27  ;;  %v501_v51 = vsel %vm481_vm1, %v458_v59, %v459_v0  ;;  %v5413_v23 = vsel %vm546_vm2, %v522_v15, %v523_v58 }
  0x29   : > { %4200 = vmatmul.mubr.msk.bf16.gmra.mrb[4].mxu0 %vm631_vm3, %v607_v57  ;;  %v5300_v57 = vld [vmem:[%s5100_s16 + $0xf8] sm:$0xff] }
  0x2a   : > { %4231 = vmatprep.mubr.msk.bf16.mxu0 %vm631_vm3, %v583_v52  ;;  %v478_v28 = vrot.slane %v5300_v57, 1  ;;  %v5324_v52 = vsel %vm546_vm2, %v515_v45, %v516_v14  ;;  %v520_v14 = vrot.slane %v5128_v17, 2  ;;  %v457_v45 = vrot.slane %v5190_v43, 1 }
  0x2c   : > { %v5361_v8 = vsel %vm546_vm2, %v519_v27, %v520_v14  ;;  %v5381_v13 = vsel %vm546_vm2, %v520_v14, %v521_v44 }
  0x31   : > { %4232 = vmatmul.mubr.msk.bf16.vlgmr.msra.gmra.mrb[0].mxu0 %vm631_vm3, %v584_v46  ;;  %v456_v46 = vrot.slane %v5187_v42, 1  ;;  %v5432_v42 = vsel %vm546_vm2, %v524_v60, %v525_v63 }
  0x32   : > { %4264 = vmatpush3.bf16.msra.mxu0 %v5184_v41  ;;  %4235 = vmatprep.mubr.msk.bf16.mxu0 %vm631_vm3, %v585_v53  ;;  %v5377_v41 = vsel %vm546_vm2, %v521_v44, %v522_v15  ;;  %v502_v44 = vsel %vm481_vm1, %v457_v45, %v458_v59  ;;  %v5424_v59 = vsel %vm546_vm2, %v525_v63, %v526_v2 }
  0x33   : > { %4667 = vmatprep.subr.msk.bf16.mxu0 %vm680_vm0, %v5169_v35  ;;  %v503_v53 = vsel %vm481_vm1, %v456_v46, %v457_v45  ;;  %v504_v27 = vsel %vm481_vm1, %v455_v34, %v456_v46  ;;  %v609_v16 = vpack.c.bf16 %v501_v51, %v502_v44  ;;  %v5407_v35 = vsel %vm546_vm2, %v523_v58, %v524_v60 }
  0x34   : > { %v608_v14 = vpack.c.bf16 %v503_v53, %v504_v27  ;;  %v500_v60 = vsel %vm481_vm1, %v459_v0, %v460_v1  ;;  %v6964_v45 = vrot.slane %v5222_v56, 1  ;;  %v6965_v46 = vrot.slane %v5219_v55, 2 }
  0x35   : > { %v6966_v51 = vrot.slane %v5205_v49, 2  ;;  %v6999_v58 = vrot.slane %v5249_v21, 1  ;;  %v482_v34 = vsel %vm481_vm1, %v477_v10, %v478_v28 }
  0x36   : > { %4266 = vmatpush3.bf16.msra.mxu0 %v5209_v50  ;;  %v499_v50 = vsel %vm481_vm1, %v460_v1, %v461_v12  ;;  %4203 = vmatprep.mubr.msk.bf16.mxu1 %vm631_vm3, %v608_v14  ;;  %v497_v15 = vsel %vm481_vm1, %v6964_v45, %v463_v26  ;;  %v6969_v27 = vmov %v6964_v45 }
  0x37   : > { %4204 = vmatmul.mubr.msk.bf16.vlgmr.msra.gmra.mrb[0].mxu1 %vm631_vm3, %v609_v16  ;;  %v610_v63 = vpack.c.bf16 %v499_v50, %v500_v60  ;;  %v5462_v53 = vsel %vm546_vm2, %v6966_v51, %v6965_v46  ;;  %v6967_v0 = vmov %v6966_v51  ;;  %v6968_v16 = vpack.c.bf16 %v5131_v18, %v5128_v17 }
  0x38   : > { %v5470_v1 = vsel %vm546_vm2, %v526_v2, %v6967_v0  ;;  %v498_v44 = vsel %vm481_vm1, %v461_v12, %v6969_v27  ;;  %v6970_v50 = vrot.slane %v5228_v61, 2  ;;  %v6971_v2 = vrot.slane %v5222_v56, 2 }
  0x39   : > { %4236 = vmatmul.mubr.msk.bf16.gmra.mrb[4].mxu0 %vm631_vm3, %v6968_v16  ;;  %v6973_v18 = vmov %v6965_v46  ;;  %4207 = vmatprep.mubr.msk.bf16.mxu1 %vm631_vm3, %v610_v63  ;;  %v6974_v46 = vrot.slane %v5238_v3, 1  ;;  %v6975_v51 = vrot.slane %v5231_v62, 1  ;;  %v6978_v63 = vrot.slane %v5231_v62, 2 }
  0x3a   : > { %v5490_v60 = vsel %vm546_vm2, %v6971_v2, %v6970_v50  ;;  %v6972_v17 = vmov %v6971_v2  ;;  %4239 = vmatprep.mubr.msk.bf16.mxu0 %vm631_vm3, %v587_v36  ;;  %v6977_v36 = vrot.slane %v5238_v3, 2  ;;  %v6984_v12 = vrot.slane %v5238_v3, 2 }
  0x3b   : > { %v5498_v45 = vsel %vm546_vm2, %v6973_v18, %v6972_v17  ;;  %v495_v0 = vsel %vm481_vm1, %v6975_v51, %v6974_v46  ;;  %v6976_v16 = vmov %v6975_v51  ;;  %v6979_v2 = vmov %v6978_v63 }
  0x3c   : > { %v496_v27 = vsel %vm481_vm1, %v463_v26, %v6976_v16  ;;  %v5522_v50 = vsel %vm546_vm2, %v6978_v63, %v6977_v36  ;;  %v6980_v17 = vrot.slane %v5228_v61, 2  ;;  %v611_v46 = vpack.c.bf16 %v497_v15, %v498_v44 }
  0x3d   : > { %v6981_v51 = vrot.slane %v5249_v21, 2  ;;  %v6982_v16 = vrot.slane %v5241_v4, 2  ;;  %v588_v15 = vpack.c.bf16 %v5199_v47, %v5190_v43  ;;  %v612_v44 = vpack.c.bf16 %v495_v0, %v496_v27 }
  0x3e   : > { %v5530_v18 = vsel %vm546_vm2, %v6980_v17, %v6979_v2  ;;  %v589_v26 = vpack.c.bf16 %v5205_v49, %v5202_v48  ;;  %v6989_v48 = vrot.slane %v5270_v37, 2  ;;  %v6990_v49 = vrot.slane %v5262_v30, 2 }
  0x3f   : > { %v5540_v36 = vsel %vm546_vm2, %v6982_v16, %v6981_v51  ;;  %v6983_v63 = vmov %v6982_v16  ;;  %v6985_v51 = vrot.slane %v5259_v29, 2  ;;  %v6986_v16 = vrot.slane %v5252_v22, 2  ;;  %4208 = vmatmul.mubr.msk.bf16.gmra.mrb[4].mxu1 %vm631_vm3, %v611_v46 }
  0x40   : > { %v5548_v2 = vsel %vm546_vm2, %v6984_v12, %v6983_v63  ;;  %v6988_v63 = vrot.slane %v5249_v21, 2  ;;  %v5580_v0 = vsel %vm546_vm2, %v6990_v49, %v6989_v48  ;;  %v6991_v27 = vmov %v6990_v49  ;;  %4211 = vmatprep.mubr.msk.bf16.mxu1 %vm631_vm3, %v612_v44 }
  0x41   : > { %v5562_v14 = vsel %vm546_vm2, %v6986_v16, %v6985_v51  ;;  %v6987_v12 = vmov %v6986_v16  ;;  %v5588_v16 = vsel %vm546_vm2, %v6985_v51, %v6991_v27  ;;  %v6995_v49 = vrot.slane %v5238_v3, 1  ;;  %4240 = vmatmul.mubr.msk.bf16.gmra.mrb[8].mxu0 %vm631_vm3, %v588_v15 }
  0x42   : > { %v5570_v43 = vsel %vm546_vm2, %v6988_v63, %v6987_v12  ;;  %v6992_v12 = vrot.slane %v5249_v21, 1  ;;  %v6993_v63 = vrot.slane %v5241_v4, 1  ;;  %v6996_v46 = vrot.slane %v5259_v29, 1  ;;  %4243 = vmatprep.mubr.msk.bf16.mxu0 %vm631_vm3, %v589_v26 }
  0x43   : > { %v6997_v51 = vrot.slane %v5252_v22, 1  ;;  %v7000_v15 = vrot.slane %v5273_v38, 2  ;;  %v5650_v26 = vsel %vm546_vm2, %v540_v54, %v541_v11 }
  0x44   : > { %v493_v47 = vsel %vm481_vm1, %v6993_v63, %v6992_v12  ;;  %v6994_v48 = vmov %v6993_v63 }
  0x45   : > { %v494_v17 = vsel %vm481_vm1, %v6995_v49, %v6994_v48  ;;  %v491_v12 = vsel %vm481_vm1, %v6997_v51, %v6996_v46  ;;  %v6998_v63 = vmov %v6997_v51  ;;  %v5625_v44 = vsel %vm546_vm2, %v7000_v15, %v540_v54 }
  0x46   : > { %v492_v48 = vsel %vm481_vm1, %v6999_v58, %v6998_v63  ;;  %v7001_v49 = vmov %v7000_v15  ;;  %v7002_v46 = vrot.slane %v5270_v37, 2  ;;  %v5642_v58 = vsel %vm546_vm2, %v541_v11, %v542_v20 }
  0x47   : > { %v590_v63 = vpack.c.bf16 %v5222_v56, %v5219_v55  ;;  %v613_v15 = vpack.c.bf16 %v493_v47, %v494_v17  ;;  %v614_v27 = vpack.c.bf16 %v491_v12, %v492_v48  ;;  %v7003_v54 = vrot.slane %v5103_v6, 1 }
  0x48   : > { %v5634_v51 = vsel %vm546_vm2, %v7002_v46, %v7001_v49  ;;  %v7004_v56 = vrot.slane %v5297_v40, 2  ;;  %v7005_v11 = vrot.slane %v5294_v39, 2  ;;  %v7007_v46 = vrot.slane %v5300_v57, 2 }
  0x49   : > { %v513_v55 = vsel %vm481_vm1, %v478_v28, %v7003_v54  ;;  %v7009_v54 = vrot.slane %v5103_v6, 2  ;;  %4212 = vmatmul.mubr.msk.bf16.gmra.mrb[8].mxu1 %vm631_vm3, %v613_v15  ;;  %4244 = vmatmul.mubr.msk.bf16.gmra.mrb[12].mxu0 %vm631_vm3, %v590_v63  ;;  %v7012_v6 = vrot.slane %v5262_v30, 1 }
  0x4a   : > { %v548_v17 = vsel %vm546_vm2, %v7005_v11, %v7004_v56  ;;  %v619_v47 = vpack.c.bf16 %v513_v55, %v482_v34  ;;  %v7006_v12 = vmov %v7005_v11  ;;  %v7008_v49 = vmov %v7004_v56  ;;  %4215 = vmatprep.mubr.msk.bf16.mxu1 %vm631_vm3, %v614_v27 }
  0x4b   : > { %v549_v48 = vsel %vm546_vm2, %v542_v20, %v7006_v12  ;;  %v547_v28 = vsel %vm546_vm2, %v7008_v49, %v7007_v46  ;;  %v7010_v7 = vmov %v7007_v46  ;;  %v591_v55 = vpack.c.bf16 %v5231_v62, %v5228_v61 }
  0x4c   : > { %v578_v34 = vsel %vm546_vm2, %v7010_v7, %v7009_v54  ;;  %v1087_v56 = vpack.c.bf16 %v548_v17, %v549_v48  ;;  %v7011_v20 = vrot.slane %v5270_v37, 1  ;;  %v7013_v7 = vmov %v7012_v6 }
  0x4d   : > { %v1088_v11 = vpack.c.bf16 %v578_v34, %v547_v28  ;;  %v7014_v46 = vrot.slane %v5259_v29, 1  ;;  %4247 = vmatprep.mubr.msk.bf16.mxu0 %vm631_vm3, %v591_v55  ;;  %v7015_v62 = vrot.slane %v5281_v33, 1  ;;  %v7016_v27 = vrot.slane %v5273_v38, 1 }
  0x4e   : > { %v489_v49 = vsel %vm481_vm1, %v7012_v6, %v7011_v20  ;;  %v7018_v17 = vmov %v7011_v20  ;;  %v592_v28 = vpack.c.bf16 %v5241_v4, %v5238_v3  ;;  %v474_v54 = vrot.slane %v5284_v31, 1 }
  0x4f   : > { %v490_v61 = vsel %vm481_vm1, %v7014_v46, %v7013_v7  ;;  %v487_v63 = vsel %vm481_vm1, %v7016_v27, %v7015_v62  ;;  %v7017_v15 = vmov %v7016_v27  ;;  %v475_v34 = vrot.slane %v5291_v25, 1 }
  0x50   : > { %v488_v12 = vsel %vm481_vm1, %v7018_v17, %v7017_v15  ;;  %v615_v48 = vpack.c.bf16 %v489_v49, %v490_v61  ;;  %v593_v20 = vpack.c.bf16 %v5252_v22, %v5249_v21  ;;  %v476_v6 = vrot.slane %v5294_v39, 1 }
  0x51   : > { %v616_v55 = vpack.c.bf16 %v487_v63, %v488_v12  ;;  %4248 = vmatmul.mubr.msk.bf16.gmra.mrb[16].mxu0 %vm631_vm3, %v592_v28  ;;  %v485_v49 = vsel %vm481_vm1, %v474_v54, %v475_v34  ;;  %v7019_v3 = vmov %v7015_v62  ;;  %v594_v46 = vpack.c.bf16 %v5262_v30, %v5259_v29  ;;  %v4849_v28 = vld [vmem:[%s6932_s4 + $0x30] sm:$0xff]  }
  0x52   : > { %4216 = vmatmul.mubr.msk.bf16.gmra.mrb[12].mxu1 %vm631_vm3, %v615_v48  ;;  %v486_v4 = vsel %vm481_vm1, %v7019_v3, %v474_v54  ;;  %4251 = vmatprep.mubr.msk.bf16.mxu0 %vm631_vm3, %v593_v20  ;;  %v483_v21 = vsel %vm481_vm1, %v476_v6, %v477_v10  ;;  %v484_v22 = vsel %vm481_vm1, %v475_v34, %v476_v6  ;;  %v5892_v48 = vld [vmem:[%s6931_s3] ss:$0 sm:$0xff]  ;;  %v4963_v54 = vmov 65535  }
  0x53   : > { %4219 = vmatprep.mubr.msk.bf16.mxu1 %vm631_vm3, %v616_v55  ;;  %v617_v7 = vpack.c.bf16 %v485_v49, %v486_v4  ;;  %v618_v61 = vpack.c.bf16 %v483_v21, %v484_v22  ;;  %v595_v62 = vpack.c.bf16 %v5273_v38, %v5270_v37  ;;  %v596_v10 = vpack.c.bf16 %v5284_v31, %v5281_v33 }
  0x54   : > { %v597_v27 = vpack.c.bf16 %v5294_v39, %v5291_v25  ;;  %v598_v29 = vpack.c.bf16 %v5300_v57, %v5297_v40  ;;  %v7020_v30 = vpack.c.bf16 %v5324_v52, %v5332_v19  ;;  %v7021_v31 = vpack.c.bf16 %v5340_v32, %v5150_v24 }
  0x55   : > { %v7022_v25 = vpack.c.bf16 %v5361_v8, %v5367_v9  ;;  %v7023_v33 = vpack.c.bf16 %v5377_v41, %v5381_v13  ;;  %v7024_v19 = vpack.c.bf16 %v5407_v35, %v5413_v23  ;;  %v7025_v24 = vpack.c.bf16 %v5424_v59, %v5432_v42  ;;  %v4843_v9 = vld [vmem:[%s6932_s4] sm:$0xff]   ;;  %v4844_v41 = vld [vmem:[%s6932_s4 + $0x8] sm:$0xff]   ;;  %v4845_v23 = vld [vmem:[%s6932_s4 + $0x10] sm:$0xff]  }
  0x56   : > { %v7026_v32 = vpack.c.bf16 %v5462_v53, %v5470_v1  ;;  %v7027_v37 = vpack.c.bf16 %v5490_v60, %v5498_v45  ;;  %v7028_v38 = vpack.c.bf16 %v5522_v50, %v5530_v18  ;;  %v7029_v39 = vpack.c.bf16 %v5540_v36, %v5548_v2  ;;  %4299 = vmatprep.subr.bf16.mxu1 %v4843_v9  ;;  %v4846_v53 = vld [vmem:[%s6932_s4 + $0x18] sm:$0xff]   ;;  %v4847_v60 = vld [vmem:[%s6932_s4 + $0x20] sm:$0xff]   ;;  %v4848_v18 = vld [vmem:[%s6932_s4 + $0x28] sm:$0xff]  }
  0x57   : > { %v7030_v40 = vpack.c.bf16 %v5562_v14, %v5570_v43  ;;  %v7031_v57 = vpack.c.bf16 %v5580_v0, %v5588_v16  ;;  %v7032_v52 = vpack.c.bf16 %v5625_v44, %v5634_v51  ;;  %v7033_v8 = vpack.c.bf16 %v5642_v58, %v5650_v26  ;;  %4300 = vmatpush3.bf16.msra.mxu1 %v4843_v9 }
  0x58   : > { %4301 = vmatprep.subr.bf16.mxu1 %v4844_v41  ;;  %v1697_v34 = vsel %vm1695_vm4, 4294967295, %v4963_v54 }
  0x59   : > { %4252 = vmatmul.mubr.msk.bf16.gmra.mrb[20].mxu0 %vm631_vm3, %v594_v46  ;;  %v5897_v20 = vsel %vm1696_vm5, %v1697_v34, 0 }
  0x5a   : > { %4220 = vmatmul.mubr.msk.bf16.gmra.mrb[16].mxu1 %vm631_vm3, %v617_v7  ;;  %4255 = vmatprep.mubr.msk.bf16.mxu0 %vm631_vm3, %v595_v62  ;;  %v1700_v49 = vand.u32 %v4849_v28, %v5897_v20 }
  0x5b   : > { %4223 = vmatprep.mubr.msk.bf16.mxu1 %vm631_vm3, %v618_v61  ;;  %4302 = vmatpush3.bf16.msra.mxu1 %v4844_v41 }
  0x5c   : > { %4303 = vmatprep.subr.bf16.mxu1 %v4845_v23 }
  0x5f   : > { %4304 = vmatpush3.bf16.msra.mxu1 %v4845_v23 }
  0x60   : > { %4305 = vmatprep.subr.bf16.mxu1 %v4846_v53 }
  0x61   : > { %4256 = vmatmul.mubr.msk.bf16.gmra.mrb[24].mxu0 %vm631_vm3, %v596_v10 }
  0x62   : > { %4224 = vmatmul.mubr.msk.bf16.gmra.mrb[20].mxu1 %vm631_vm3, %v619_v47  ;;  %4259 = vmatprep.mubr.msk.bf16.mxu0 %vm631_vm3, %v597_v27 }
  0x63   : > { %4306 = vmatpush3.bf16.msra.mxu1 %v4846_v53 }
  0x64   : > { %4307 = vmatprep.subr.bf16.mxu1 %v4847_v60 }
  0x67   : > { %4308 = vmatpush3.bf16.msra.mxu1 %v4847_v60 }
  0x68   : > { %4309 = vmatprep.subr.bf16.mxu1 %v4848_v18 }
  0x69   : > { %4260 = vmatmul.mubr.msk.bf16.gmra.mrb[28].mxu0 %vm631_vm3, %v598_v29 }
  0x6a   : > { %4267 = vmatprep.mubr.msk.bf16.mxu0 %vm631_vm3, %v7020_v30 }
  0x6b   : > { %4310 = vmatpush3.bf16.msra.mxu1 %v4848_v18 }
  0x6c   : > { %4311 = vmatprep.subr.bf16.mxu1 %v1700_v49 }
  0x6f   : > { %4312 = vmatpush3.bf16.msra.mxu1 %v1700_v49 }
  0x71   : > { %4268 = vmatmul.mubr.msk.bf16.vlgmr.msra.gmra.mrb[0].mxu0 %vm631_vm3, %v7021_v31 }
  0x72   : > { %4271 = vmatprep.mubr.msk.bf16.mxu0 %vm631_vm3, %v7022_v25 }
  0x79   : > { %4272 = vmatmul.mubr.msk.bf16.gmra.mrb[4].mxu0 %vm631_vm3, %v7023_v33 }
  0x7a   : > { %4275 = vmatprep.mubr.msk.bf16.mxu0 %vm631_vm3, %v7024_v19 }
  0x81   : > { %4276 = vmatmul.mubr.msk.bf16.gmra.mrb[8].mxu0 %vm631_vm3, %v7025_v24 }
  0x82   : > { %4279 = vmatprep.mubr.msk.bf16.mxu0 %vm631_vm3, %v7026_v32 }
  0x89   : > { %4280 = vmatmul.mubr.msk.bf16.gmra.mrb[12].mxu0 %vm631_vm3, %v7027_v37 }
  0x8a   : > { %4283 = vmatprep.mubr.msk.bf16.mxu0 %vm631_vm3, %v7028_v38 }
  0x91   : > { %4284 = vmatmul.mubr.msk.bf16.gmra.mrb[16].mxu0 %vm631_vm3, %v7029_v39 }
  0x92   : > { %4287 = vmatprep.mubr.msk.bf16.mxu0 %vm631_vm3, %v7030_v40 }
  0x99   : > { %4288 = vmatmul.mubr.msk.bf16.gmra.mrb[20].mxu0 %vm631_vm3, %v7031_v57 }
  0x9a   : > { %4291 = vmatprep.mubr.msk.bf16.mxu0 %vm631_vm3, %v7032_v52 }
  0xa1   : > { %4292 = vmatmul.mubr.msk.bf16.gmra.mrb[24].mxu0 %vm631_vm3, %v7033_v8 }
  0xa2   : > { %4295 = vmatprep.mubr.msk.bf16.mxu0 %vm631_vm3, %v1087_v56 }
  0xa9   : > { %4296 = vmatmul.mubr.msk.bf16.gmra.mrb[28].mxu0 %vm631_vm3, %v1088_v11 }
 0x10a   : > { %v5829_v13 = vpop.f32.mrb[0].mxu1 }
 0x10b   : > { %v5831_v35 = vpop.f32.mrb[1].mxu1 }
 0x10c   : > { %v5836_v59 = vpop.f32.mrb[2].mxu1 }
 0x10d   : > { %v5838_v42 = vpop.f32.mrb[3].mxu1 }
 0x112   : > { %v5843_v1 = vpop.f32.mrb[4].mxu1 }
 0x113   : > { %v5845_v14 = vpop.f32.mrb[5].mxu1 }
 0x114   : > { %v5850_v45 = vpop.f32.mrb[6].mxu1 }
 0x115   : > { %v5852_v50 = vpop.f32.mrb[7].mxu1 }
 0x11c   : > { %v5857_v36 = vpop.f32.mrb[8].mxu1 }
 0x11d   : > { %v5859_v2 = vpop.f32.mrb[9].mxu1 }
 0x11e   : > { %v5861_v43 = vpop.f32.mrb[10].mxu1 }
 0x11f   : > { %v5863_v0 = vpop.f32.mrb[11].mxu1 }
 0x125   : > { %v5865_v16 = vpop.f32.mrb[12].mxu1 }
 0x126   : > { %v5867_v44 = vpop.f32.mrb[13].mxu1 }
 0x127   : > { %v5869_v51 = vpop.f32.mrb[14].mxu1 }
 0x128   : > { %v5871_v58 = vpop.f32.mrb[15].mxu1 }
 0x12d   : > { %v5873_v26 = vpop.f32.mrb[16].mxu1 }
 0x12e   : > { %v5875_v47 = vpop.f32.mrb[17].mxu1 }
 0x12f   : > { %v5877_v56 = vpop.f32.mrb[18].mxu1 }
 0x130   : > { %v5879_v11 = vpop.f32.mrb[19].mxu1 }
 0x135   : > { %v5881_v63 = vpop.f32.mrb[20].mxu1 }
 0x136   : > { %v5883_v15 = vpop.f32.mrb[21].mxu1 }
 0x137   : > { %v5885_v17 = vpop.f32.mrb[22].mxu1 }
 0x138   : > { %v5887_v12 = vpop.f32.mrb[23].mxu1 }
 0x144   : > { %v4269_v55 = vpop.f32.mrb[0].mxu0 }
 0x145   : > { %v1185_v6 = vpop.f32.mrb[1].mxu0  ;;  %v5910_v46 = vadd.f32 %v4269_v55, %v5892_v48 }
 0x146   : > { %v5901_v3 = vadd.f32 %v5892_v48, %v1185_v6  ;;  %v4270_v4 = vpop.f32.mrb[2].mxu0 }
 0x147   : > { %v1188_v21 = vpop.f32.mrb[3].mxu0  ;;  %v5904_v22 = vadd.f32 %v4270_v4, %v5892_v48  ;;  %v1385_v31 = vmax.f32 %v5910_v46, 0.0 }
 0x148   : > { %v5907_v7 = vadd.f32 %v5892_v48, %v1188_v21  ;;  %v1383_v61 = vmax.f32 %v5901_v3, 0.0 }
 0x149   : > { %v1386_v10 = vmax.f32 %v5904_v22, 0.0 }
 0x14a   : > { %v1384_v62 = vmax.f32 %v5907_v7, 0.0 }
 0x14b   : > { %v4720_v24 = vpack.i.bf16 %v1386_v10, %v1385_v31 }
 0x14c   : > { %v4273_v27 = vpop.f32.mrb[4].mxu0  ;;  %v4715_v29 = vpack.i.bf16 %v1384_v62, %v1383_v61 }
 0x14d   : > { %v1201_v30 = vpop.f32.mrb[5].mxu0  ;;  %v5935_v38 = vadd.f32 %v4273_v27, %v5892_v48 }
 0x14e   : > { %v5921_v25 = vadd.f32 %v5892_v48, %v1201_v30  ;;  %4716 = vrot.lane.b32.xlu0 %v4715_v29, %s6952_s26  ;;  %v4274_v33 = vpop.f32.mrb[6].mxu0 }
 0x14f   : > { %v1204_v19 = vpop.f32.mrb[7].mxu0  ;;  %v5929_v32 = vadd.f32 %v4274_v33, %v5892_v48  ;;  %v1389_v23 = vmax.f32 %v5935_v38, 0.0 }
 0x150   : > { %v5932_v37 = vadd.f32 %v5892_v48, %v1204_v19  ;;  %v1387_v39 = vmax.f32 %v5921_v25, 0.0 }
 0x151   : > { %v1390_v57 = vmax.f32 %v5929_v32, 0.0 }
 0x152   : > { %v1388_v40 = vmax.f32 %v5932_v37, 0.0  ;;  %4721 = vrot.lane.b32.xlu0 %v4720_v24, %s6952_s26 }
 0x153   : > { %v4730_v34 = vpack.i.bf16 %v1390_v57, %v1389_v23 }
 0x154   : > { %v4277_v52 = vpop.f32.mrb[8].mxu0  ;;  %v4725_v8 = vpack.i.bf16 %v1388_v40, %v1387_v39 }
 0x155   : > { %v4543_v9 = vadd.f32 %v4277_v52, %v5829_v13  ;;  %v1217_v41 = vpop.f32.mrb[9].mxu0 }
 0x156   : > { %v4544_v53 = vadd.f32 %v1217_v41, %v5831_v35  ;;  %4726 = vrot.lane.b32.xlu1 %v4725_v8, %s6952_s26  ;;  %v4278_v60 = vpop.f32.mrb[10].mxu0 }
 0x157   : > { %v5950_v18 = vadd.f32 %v4543_v9, %v5892_v48  ;;  %v4545_v28 = vadd.f32 %v4278_v60, %v5836_v59  ;;  %v1220_v54 = vpop.f32.mrb[11].mxu0 }
 0x158   : > { %v5958_v13 = vadd.f32 %v4544_v53, %v5892_v48  ;;  %v4546_v55 = vadd.f32 %v1220_v54, %v5838_v42 }
 0x159   : > { %v5962_v35 = vadd.f32 %v4545_v28, %v5892_v48  ;;  %v1393_v59 = vmax.f32 %v5950_v18, 0.0 }
 0x15a   : > { %v5965_v6 = vadd.f32 %v4546_v55, %v5892_v48  ;;  %4731 = vrot.lane.b32.xlu1 %v4730_v34, %s6952_s26  ;;  %v1391_v4 = vmax.f32 %v5958_v13, 0.0 }
 0x15b   : > { %v1394_v49 = vmax.f32 %v5962_v35, 0.0 }
 0x15c   : > { %v1392_v21 = vmax.f32 %v5965_v6, 0.0  ;;  %v4281_v27 = vpop.f32.mrb[12].mxu0 }
 0x15d   : > { %v4547_v29 = vadd.f32 %v4281_v27, %v5843_v1  ;;  %v1233_v42 = vpop.f32.mrb[13].mxu0  ;;  %v4740_v30 = vpack.i.bf16 %v1394_v49, %v1393_v59 }
 0x15e   : > { %v4548_v33 = vadd.f32 %v1233_v42, %v5845_v14  ;;  %v4282_v19 = vpop.f32.mrb[14].mxu0  ;;  %v4735_v24 = vpack.i.bf16 %v1392_v21, %v1391_v4 }
 0x15f   : > { %v5983_v52 = vadd.f32 %v4547_v29, %v5892_v48  ;;  %v4549_v8 = vadd.f32 %v4282_v19, %v5850_v45  ;;  %4741 = vrot.lane.b32.xlu1 %v4740_v30, %s6952_s26  ;;  %v1236_v1 = vpop.f32.mrb[15].mxu0 }
 0x160   : > { %v5988_v9 = vadd.f32 %v4548_v33, %v5892_v48  ;;  %v4550_v41 = vadd.f32 %v1236_v1, %v5852_v50  ;;  %4736 = vrot.lane.b32.xlu0 %v4735_v24, %s6952_s26 }
 0x161   : > { %v5993_v14 = vadd.f32 %v4549_v8, %v5892_v48  ;;  %v1397_v60 = vmax.f32 %v5983_v52, 0.0 }
 0x162   : > { %v5996_v53 = vadd.f32 %v4550_v41, %v5892_v48  ;;  %v1395_v28 = vmax.f32 %v5988_v9, 0.0 }
 0x163   : > { %v1398_v45 = vmax.f32 %v5993_v14, 0.0 }
 0x164   : > { %v1396_v54 = vmax.f32 %v5996_v53, 0.0  ;;  %v4285_v34 = vpop.f32.mrb[16].mxu0 }
 0x165   : > { %v4551_v55 = vadd.f32 %v4285_v34, %v5857_v36  ;;  %v1249_v50 = vpop.f32.mrb[17].mxu0  ;;  %v4750_v27 = vpack.i.bf16 %v1398_v45, %v1397_v60 }
 0x166   : > { %v4552_v29 = vadd.f32 %v1249_v50, %v5859_v2  ;;  %v4286_v42 = vpop.f32.mrb[18].mxu0  ;;  %v4745_v30 = vpack.i.bf16 %v1396_v54, %v1395_v28 }
 0x167   : > { %v6013_v33 = vadd.f32 %v4551_v55, %v5892_v48  ;;  %v4553_v19 = vadd.f32 %v4286_v42, %v5861_v43  ;;  %4751 = vrot.lane.b32.xlu1 %v4750_v27, %s6952_s26  ;;  %v1252_v36 = vpop.f32.mrb[19].mxu0 }
 0x168   : > { %v6018_v24 = vadd.f32 %v4552_v29, %v5892_v48  ;;  %v4554_v8 = vadd.f32 %v1252_v36, %v5863_v0  ;;  %4746 = vrot.lane.b32.xlu0 %v4745_v30, %s6952_s26 }
 0x169   : > { %v6023_v2 = vadd.f32 %v4553_v19, %v5892_v48  ;;  %v6943_v41 = vmax.f32 %v6013_v33, 0.0  ;;  %v7035_v53 = vmax.f32 %v6013_v33, 0.0 }
 0x16a   : > { %v6026_v1 = vadd.f32 %v4554_v8, %v5892_v48  ;;  %v6944_v34 = vmax.f32 %v6018_v24, 0.0 }
 0x16b   : > { %v6946_v43 = vmax.f32 %v6023_v2, 0.0  ;;  %v7034_v52 = vmax.f32 %v6023_v2, 0.0 }
 0x16c   : > { %v6945_v55 = vmax.f32 %v6026_v1, 0.0  ;;  %v4289_v50 = vpop.f32.mrb[20].mxu0  ;;  %v7036_v9 = vmax.f32 %v6026_v1, 0.0 }
 0x16d   : > { %v4555_v27 = vadd.f32 %v4289_v50, %v5865_v16  ;;  %v1265_v0 = vpop.f32.mrb[21].mxu0  ;;  %v4760_v29 = vpack.i.bf16 %v6946_v43, %v6943_v41 }
 0x16e   : > { %v4556_v42 = vadd.f32 %v1265_v0, %v5867_v44  ;;  %v4290_v30 = vpop.f32.mrb[22].mxu0  ;;  %v4755_v19 = vpack.i.bf16 %v6945_v55, %v6944_v34 }
 0x16f   : > { %v6043_v36 = vadd.f32 %v4555_v27, %v5892_v48  ;;  %v4557_v8 = vadd.f32 %v4290_v30, %v5869_v51  ;;  %4761 = vrot.lane.b32.xlu1 %v4760_v29, %s6952_s26  ;;  %v1268_v16 = vpop.f32.mrb[23].mxu0 }
 0x170   : > { %v6048_v50 = vadd.f32 %v4556_v42, %v5892_v48  ;;  %v4558_v41 = vadd.f32 %v1268_v16, %v5871_v58  ;;  %4756 = vrot.lane.b32.xlu0 %v4755_v19, %s6952_s26 }
 0x171   : > { %v6053_v44 = vadd.f32 %v4557_v8, %v5892_v48  ;;  %v6947_v27 = vmax.f32 %v6043_v36, 0.0  ;;  %v7039_v1 = vmax.f32 %v6043_v36, 0.0 }
 0x172   : > { %v6056_v0 = vadd.f32 %v4558_v41, %v5892_v48  ;;  %v6948_v29 = vmax.f32 %v6048_v50, 0.0 }
 0x173   : > { %v6950_v51 = vmax.f32 %v6053_v44, 0.0  ;;  %v7038_v33 = vmax.f32 %v6053_v44, 0.0 }
 0x174   : > { %v6949_v30 = vmax.f32 %v6056_v0, 0.0  ;;  %v4293_v42 = vpop.f32.mrb[24].mxu0 }
 0x175   : > { %v4559_v34 = vadd.f32 %v4293_v42, %v5873_v26  ;;  %v1281_v58 = vpop.f32.mrb[25].mxu0  ;;  %v4770_v19 = vpack.i.bf16 %v6950_v51, %v6947_v27 }
 0x176   : > { %v4560_v41 = vadd.f32 %v1281_v58, %v5875_v47  ;;  %v4294_v8 = vpop.f32.mrb[26].mxu0  ;;  %v4765_v16 = vpack.i.bf16 %v6949_v30, %v6948_v29 }
 0x177   : > { %v6073_v55 = vadd.f32 %v4559_v34, %v5892_v48  ;;  %v4561_v43 = vadd.f32 %v4294_v8, %v5877_v56  ;;  %4771 = vrot.lane.b32.xlu1 %v4770_v19, %s6952_s26  ;;  %v1284_v26 = vpop.f32.mrb[27].mxu0 }
 0x178   : > { %v6078_v42 = vadd.f32 %v4560_v41, %v5892_v48  ;;  %v4562_v27 = vadd.f32 %v1284_v26, %v5879_v11  ;;  %4766 = vrot.lane.b32.xlu0 %v4765_v16, %s6952_s26 }
 0x179   : > { %v6083_v47 = vadd.f32 %v4561_v43, %v5892_v48  ;;  %v6951_v34 = vmax.f32 %v6073_v55, 0.0 }
 0x17a   : > { %v6086_v58 = vadd.f32 %v4562_v27, %v5892_v48  ;;  %v6958_v19 = vmax.f32 %v6078_v42, 0.0 }
 0x17b   : > { %v1410_v56 = vmax.f32 %v6083_v47, 0.0 }
 0x17c   : > { %v6959_v8 = vmax.f32 %v6086_v58, 0.0  ;;  %v4297_v41 = vpop.f32.mrb[28].mxu0 }
 0x17d   : > { %v4563_v29 = vadd.f32 %v4297_v41, %v5881_v63  ;;  %v1297_v11 = vpop.f32.mrb[29].mxu0  ;;  %v4780_v43 = vpack.i.bf16 %v1410_v56, %v6951_v34 }
 0x17e   : > { %v4564_v27 = vadd.f32 %v1297_v11, %v5883_v15  ;;  %v4298_v16 = vpop.f32.mrb[30].mxu0  ;;  %v4775_v26 = vpack.i.bf16 %v6959_v8, %v6958_v19 }
 0x17f   : > { %v6103_v30 = vadd.f32 %v4563_v29, %v5892_v48  ;;  %v4565_v51 = vadd.f32 %v4298_v16, %v5885_v17  ;;  %4781 = vrot.lane.b32.xlu1 %v4780_v43, %s6952_s26  ;;  %v1300_v63 = vpop.f32.mrb[31].mxu0 }
 0x180   : > { %v6108_v41 = vadd.f32 %v4564_v27, %v5892_v48  ;;  %v4566_v34 = vadd.f32 %v1300_v63, %v5887_v12  ;;  %4776 = vrot.lane.b32.xlu0 %v4775_v26, %s6952_s26  ;;  %v4965_v27 = vmov 0   ;;  %v1975_v26 = vld [vmem:[%s6929_s1] sm:$0xff]  ;;  %v1977_v63 = vld [vmem:[%s6929_s1 + $0x10] sm:$0xff] }
 0x181   : > { %v6113_v15 = vadd.f32 %v4565_v51, %v5892_v48  ;;  %v6956_v29 = vmax.f32 %v6103_v30, 0.0  ;;  %4796 = vset.pattern.permute.xlu1 %v4965_v27  ;;  %4795 = vset.pattern.permute.xlu0 %v4965_v27  ;;  %v1976_v51 = vld [vmem:[%s6929_s1 + $0x8] sm:$0xff]  ;;  %v1978_v27 = vld [vmem:[%s6929_s1 + $0x18] sm:$0xff] }
 0x182   : > { %v6116_v11 = vadd.f32 %v4566_v34, %v5892_v48  ;;  %v6954_v43 = vmax.f32 %v6108_v41, 0.0  ;;  %v4850_v34 = vld [vmem:[%s6933_s5 + $0x1c] sm:$0xff]  }
 0x183   : > { %v6957_v17 = vmax.f32 %v6113_v15, 0.0  ;;  %4345 = vmatprep.subr.bf16.mxu1 %v4850_v34 }
 0x184   : > { %v6955_v16 = vmax.f32 %v6116_v11, 0.0 }
 0x185   : > { %v4790_v12 = vpack.i.bf16 %v6957_v17, %v6956_v29 }
 0x186   : > { %v4785_v48 = vpack.i.bf16 %v6955_v16, %v6954_v43 }
 0x187   : > { %4791 = vrot.lane.b32.xlu1 %v4790_v12, %s6952_s26  ;;  %v1979_v12 = vld [vmem:[%s6929_s1 + $0x20] sm:$0xff] }
 0x188   : > { %4786 = vrot.lane.b32.xlu0 %v4785_v48, %s6952_s26  ;;  %v1980_v48 = vld [vmem:[%s6929_s1 + $0x28] sm:$0xff]  ;;  %s4022_s26 = sshll.u32 %s5055_s25, 7  ;;  %s3708_s25 = scalar_lea.sflag [#allocation5], %s405_s18 }
 0x189   : > { %s6886_s17 = scalar_lea.hbm %s6940_s12, %s4022_s26 }
 0x18b   : > { %1998 = vperm.xlu1 %4796, %v1976_v51   ;;  %v1981_v51 = vld [vmem:[%s6929_s1 + $0x30] sm:$0xff] }
 0x18c   : > { %1993 = vperm.xlu0 %4795, %v1975_v26   ;;  %v1982_v26 = vld [vmem:[%s6929_s1 + $0x38] sm:$0xff] }
 0x18f   : > { %2003 = vperm.xlu1 %4796, %v1977_v63   ;;  %v1983_v63 = vld [vmem:[%s6929_s1 + $0x40] sm:$0xff] }
 0x190   : > { %2008 = vperm.xlu0 %4795, %v1978_v27   ;;  %v1984_v27 = vld [vmem:[%s6929_s1 + $0x48] sm:$0xff] }
 0x193   : > { %2013 = vperm.xlu1 %4796, %v1979_v12   ;;  %v1985_v12 = vld [vmem:[%s6929_s1 + $0x50] sm:$0xff] }
 0x194   : > { %2018 = vperm.xlu0 %4795, %v1980_v48   ;;  %v1986_v48 = vld [vmem:[%s6929_s1 + $0x58] sm:$0xff] }
 0x197   : > { %2023 = vperm.xlu1 %4796, %v1981_v51   ;;  %v1987_v51 = vld [vmem:[%s6929_s1 + $0x60] sm:$0xff] }
 0x198   : > { %2028 = vperm.xlu0 %4795, %v1982_v26   ;;  %v1988_v26 = vld [vmem:[%s6929_s1 + $0x68] sm:$0xff] }
 0x19b   : > { %2033 = vperm.xlu1 %4796, %v1983_v63   ;;  %v1989_v63 = vld [vmem:[%s6929_s1 + $0x70] sm:$0xff] }
 0x19c   : > { %2038 = vperm.xlu0 %4795, %v1984_v27   ;;  %v1990_v27 = vld [vmem:[%s6929_s1 + $0x78] sm:$0xff] }
 0x19f   : > { %2043 = vperm.xlu1 %4796, %v1985_v12  }
 0x1a0   : > { %2048 = vperm.xlu0 %4795, %v1986_v48  }
 0x1a3   : > { %2053 = vperm.xlu1 %4796, %v1987_v51  }
 0x1a4   : > { %2058 = vperm.xlu0 %4795, %v1988_v26  }
 0x1a7   : > { %2063 = vperm.xlu1 %4796, %v1989_v63  }
 0x1a8   : > { %2068 = vperm.xlu0 %4795, %v1990_v27  }
 0x1c0   : > { %v4717_v12 = vpop.permute.xlu0 %4716 }
 0x1c1   : > { %v4719_v48 = vunpack.i.h.bf16 %v4717_v12  ;;  %v4718_v43 = vunpack.i.l.bf16 %v4717_v12 }
 0x1c3   : > { %v1544_v16 = vmax.f32 %v1384_v62, %v4719_v48  ;;  %v1543_v51 = vmax.f32 %v1383_v61, %v4718_v43 }
 0x1c4   : > { %v4722_v26 = vpop.permute.xlu0 %4721 }
 0x1c5   : > { %v1589_v29 = vpack.c.bf16 %v1544_v16, %v1543_v51  ;;  %v4724_v17 = vunpack.i.h.bf16 %v4722_v26  ;;  %v4723_v19 = vunpack.i.l.bf16 %v4722_v26 }
 0x1c7   : > { %v1546_v8 = vmax.f32 %v1386_v10, %v4724_v17  ;;  %v1545_v63 = vmax.f32 %v1385_v31, %v4723_v19  ;;  %4313 = vmatprep.mubr.msk.bf16.mxu1 %vm1646_vm6, %v1589_v29 }
 0x1c8   : > { %v4727_v27 = vpop.permute.xlu1 %4726 }
 0x1c9   : > { %v1590_v12 = vpack.c.bf16 %v1546_v8, %v1545_v63  ;;  %v4729_v7 = vunpack.i.h.bf16 %v4727_v27  ;;  %v4728_v62 = vunpack.i.l.bf16 %v4727_v27 }
 0x1cb   : > { %v1548_v3 = vmax.f32 %v1388_v40, %v4729_v7  ;;  %v1547_v61 = vmax.f32 %v1387_v39, %v4728_v62  ;;  %4314 = vmatmul.mubr.msk.bf16.vlgmr.msra.gmra.mrb[24].mxu1 %vm1646_vm6, %v1590_v12 }
 0x1cc   : > { %v4732_v43 = vpop.permute.xlu1 %4731  ;;  %4346 = vmatpush3.bf16.msra.mxu1 %v4850_v34 }
 0x1cd   : > { %v1591_v22 = vpack.c.bf16 %v1548_v3, %v1547_v61  ;;  %v4734_v10 = vunpack.i.h.bf16 %v4732_v43  ;;  %v4733_v46 = vunpack.i.l.bf16 %v4732_v43 }
 0x1cf   : > { %v1550_v31 = vmax.f32 %v1390_v57, %v4734_v10  ;;  %v1549_v19 = vmax.f32 %v1389_v23, %v4733_v46  ;;  %4317 = vmatprep.mubr.msk.bf16.mxu1 %vm1646_vm6, %v1591_v22 }
 0x1d1   : > { %v1592_v37 = vpack.c.bf16 %v1550_v31, %v1549_v19  ;;  %v4742_v40 = vpop.permute.xlu1 %4741 }
 0x1d2   : > { %v4744_v8 = vunpack.i.h.bf16 %v4742_v40  ;;  %v4743_v25 = vunpack.i.l.bf16 %v4742_v40  ;;  %v4737_v39 = vpop.permute.xlu0 %4736 }
 0x1d3   : > { %v4739_v29 = vunpack.i.h.bf16 %v4737_v39  ;;  %v4738_v17 = vunpack.i.l.bf16 %v4737_v39  ;;  %4318 = vmatmul.mubr.msk.bf16.gmra.mrb[28].mxu1 %vm1646_vm6, %v1592_v37  ;;  %v7041_v39 = vmax.f32 %v6048_v50, 0.0  ;;  %v7043_v50 = vmax.f32 %v6086_v58, 0.0 }
 0x1d4   : > { %v1554_v16 = vmax.f32 %v1394_v49, %v4744_v8  ;;  %v1553_v32 = vmax.f32 %v1393_v59, %v4743_v25  ;;  %v7046_v58 = vmax.f32 %v6103_v30, 0.0  ;;  %v4852_v30 = vld [vmem:[%s6933_s5 + $0x2c] sm:$0xff]  }
 0x1d5   : > { %v1552_v38 = vmax.f32 %v1392_v21, %v4739_v29  ;;  %v1551_v57 = vmax.f32 %v1391_v4, %v4738_v17 }
 0x1d6   : > { %v1594_v34 = vpack.c.bf16 %v1554_v16, %v1553_v32 }
 0x1d7   : > { %v1593_v23 = vpack.c.bf16 %v1552_v38, %v1551_v57 }
 0x1d9   : > { %4321 = vmatprep.mubr.msk.bf16.mxu1 %vm1646_vm6, %v1593_v23  ;;  %v4752_v48 = vpop.permute.xlu1 %4751 }
 0x1da   : > { %v4754_v51 = vunpack.i.h.bf16 %v4752_v48  ;;  %v4753_v26 = vunpack.i.l.bf16 %v4752_v48  ;;  %v4747_v63 = vpop.permute.xlu0 %4746 }
 0x1db   : > { %v4749_v27 = vunpack.i.h.bf16 %v4747_v63  ;;  %v4748_v35 = vunpack.i.l.bf16 %v4747_v63  ;;  %4322 = vmatmul.mubr.msk.bf16.gmra.mrb[32].mxu1 %vm1646_vm6, %v1594_v34 }
 0x1dc   : > { %v1558_v18 = vmax.f32 %v1398_v45, %v4754_v51  ;;  %v1557_v6 = vmax.f32 %v1397_v60, %v4753_v26  ;;  %v7044_v26 = vmax.f32 %v6078_v42, 0.0  ;;  %v7047_v42 = vmax.f32 %v6116_v11, 0.0 }
 0x1dd   : > { %v1556_v13 = vmax.f32 %v1396_v54, %v4749_v27  ;;  %v1555_v59 = vmax.f32 %v1395_v28, %v4748_v35  ;;  %v7037_v54 = vmax.f32 %v6018_v24, 0.0  ;;  %v7040_v24 = vmax.f32 %v6056_v0, 0.0 }
 0x1de   : > { %v1596_v4 = vpack.c.bf16 %v1558_v18, %v1557_v6  ;;  %v7042_v0 = vmax.f32 %v6073_v55, 0.0  ;;  %v7045_v55 = vmax.f32 %v6113_v15, 0.0  ;;  %v4851_v15 = vld [vmem:[%s6933_s5 + $0x24] sm:$0xff]  }
 0x1df   : > { %v1595_v49 = vpack.c.bf16 %v1556_v13, %v1555_v59  ;;  %4347 = vmatprep.subr.bf16.mxu1 %v4851_v15 }
 0x1e0   : > { %4348 = vmatpush3.bf16.msra.mxu1 %v4851_v15 }
 0x1e1   : > { %4325 = vmatprep.mubr.msk.bf16.mxu1 %vm1646_vm6, %v1595_v49  ;;  %v4762_v21 = vpop.permute.xlu1 %4761  ;;  %4349 = vmatprep.subr.bf16.mxu1 %v4852_v30 }
 0x1e2   : > { %v4764_v12 = vunpack.i.h.bf16 %v4762_v21  ;;  %v4763_v7 = vunpack.i.l.bf16 %v4762_v21  ;;  %v4757_v62 = vpop.permute.xlu0 %4756 }
 0x1e3   : > { %v4759_v3 = vunpack.i.h.bf16 %v4757_v62  ;;  %v4758_v14 = vunpack.i.l.bf16 %v4757_v62  ;;  %4326 = vmatmul.mubr.msk.bf16.gmra.mrb[36].mxu1 %vm1646_vm6, %v1596_v4 }
 0x1e4   : > { %v1562_v60 = vmax.f32 %v7034_v52, %v4764_v12  ;;  %v1561_v45 = vmax.f32 %v7035_v53, %v4763_v7  ;;  %v7048_v12 = vmax.f32 %v6108_v41, 0.0  ;;  %4350 = vmatpush3.bf16.msra.mxu1 %v4852_v30  ;;  %v4853_v41 = vld [vmem:[%s6933_s5 + $0x34] ss:$0 sps:$4 sm:$0xff]  }
 0x1e5   : > { %v1560_v28 = vmax.f32 %v7036_v9, %v4759_v3  ;;  %v1559_v61 = vmax.f32 %v7037_v54, %v4758_v14  ;;  %4668 = vmatprep.subr.msk.bf16.mxu1 %vm2228_vm7, %v4853_v41  ;;  %v2230_v11 = vsel %vm2228_vm7, %v4853_v41, 0  ;;  %v6277_v14 = vld [vmem:[%s6933_s5] sm:$0xff]  }
 0x1e6   : > { %v1598_v22 = vpack.c.bf16 %v1562_v60, %v1561_v45 }
 0x1e7   : > { %v1597_v43 = vpack.c.bf16 %v1560_v28, %v1559_v61 }
 0x1e8   : > { %4352 = vmatpush3.bf16.msra.mxu1 %v2230_v11 }
 0x1e9   : > { %4329 = vmatprep.mubr.msk.bf16.mxu1 %vm1646_vm6, %v1597_v43  ;;  %v4772_v10 = vpop.permute.xlu1 %4771  ;;  %4369 = vmatprep.subr.bf16.mxu1 %v6277_v14 }
 0x1ea   : > { %v4774_v46 = vunpack.i.h.bf16 %v4772_v10  ;;  %v4773_v31 = vunpack.i.l.bf16 %v4772_v10  ;;  %v4767_v19 = vpop.permute.xlu0 %4766 }
 0x1eb   : > { %v4769_v37 = vunpack.i.h.bf16 %v4767_v19  ;;  %v4768_v2 = vunpack.i.l.bf16 %v4767_v19  ;;  %4330 = vmatmul.mubr.msk.bf16.gmra.mrb[40].mxu1 %vm1646_vm6, %v1598_v22 }
 0x1ec   : > { %v1566_v40 = vmax.f32 %v7038_v33, %v4774_v46  ;;  %v1565_v8 = vmax.f32 %v7039_v1, %v4773_v31 }
 0x1ed   : > { %v1564_v25 = vmax.f32 %v7040_v24, %v4769_v37  ;;  %v1563_v29 = vmax.f32 %v7041_v39, %v4768_v2 }
 0x1ee   : > { %v1600_v16 = vpack.c.bf16 %v1566_v40, %v1565_v8 }
 0x1ef   : > { %v1599_v17 = vpack.c.bf16 %v1564_v25, %v1563_v29 }
 0x1f1   : > { %4333 = vmatprep.mubr.msk.bf16.mxu1 %vm1646_vm6, %v1599_v17  ;;  %v4782_v32 = vpop.permute.xlu1 %4781 }
 0x1f2   : > { %v4784_v38 = vunpack.i.h.bf16 %v4782_v32  ;;  %v4783_v57 = vunpack.i.l.bf16 %v4782_v32  ;;  %v4777_v23 = vpop.permute.xlu0 %4776 }
 0x1f3   : > { %v4779_v34 = vunpack.i.h.bf16 %v4777_v23  ;;  %v4778_v44 = vunpack.i.l.bf16 %v4777_v23  ;;  %4334 = vmatmul.mubr.msk.bf16.gmra.mrb[44].mxu1 %vm1646_vm6, %v1600_v16 }
 0x1f4   : > { %v1570_v36 = vmax.f32 %v1410_v56, %v4784_v38  ;;  %v1569_v48 = vmax.f32 %v7042_v0, %v4783_v57 }
 0x1f5   : > { %v1568_v51 = vmax.f32 %v7043_v50, %v4779_v34  ;;  %v1567_v63 = vmax.f32 %v7044_v26, %v4778_v44 }
 0x1f6   : > { %v1602_v35 = vpack.c.bf16 %v1570_v36, %v1569_v48 }
 0x1f7   : > { %v1601_v27 = vpack.c.bf16 %v1568_v51, %v1567_v63 }
 0x1f9   : > { %4337 = vmatprep.mubr.msk.bf16.mxu1 %vm1646_vm6, %v1601_v27  ;;  %v4792_v18 = vpop.permute.xlu1 %4791 }
 0x1fa   : > { %v4794_v6 = vunpack.i.h.bf16 %v4792_v18  ;;  %v4793_v13 = vunpack.i.l.bf16 %v4792_v18  ;;  %v4787_v59 = vpop.permute.xlu0 %4786 }
 0x1fb   : > { %v4789_v49 = vunpack.i.h.bf16 %v4787_v59  ;;  %v4788_v47 = vunpack.i.l.bf16 %v4787_v59  ;;  %4338 = vmatmul.mubr.msk.bf16.gmra.mrb[48].mxu1 %vm1646_vm6, %v1602_v35  ;;  %v4855_v35 = vld [vmem:[%s6933_s5 + $0x8] sm:$0xff]  }
 0x1fc   : > { %v1574_v56 = vmax.f32 %v7045_v55, %v4794_v6  ;;  %v1573_v4 = vmax.f32 %v7046_v58, %v4793_v13 }
 0x1fd   : > { %v1572_v21 = vmax.f32 %v7047_v42, %v4789_v49  ;;  %v1571_v7 = vmax.f32 %v7048_v12, %v4788_v47 }
 0x1fe   : > { %v1604_v3 = vpack.c.bf16 %v1574_v56, %v1573_v4 }
 0x1ff   : > { %v1603_v62 = vpack.c.bf16 %v1572_v21, %v1571_v7  ;;  %v4856_v7 = vld [vmem:[%s6933_s5 + $0x10] sm:$0xff]  }
 0x201   : > { %4341 = vmatprep.mubr.msk.bf16.mxu1 %vm1646_vm6, %v1603_v62 }
 0x203   : > { %4342 = vmatmul.mubr.msk.bf16.gmra.mrb[52].mxu1 %vm1646_vm6, %v1604_v3 }
 0x20a   : > { %v1999_v22 = vpop.permute.xlu1 %1998 }
 0x20b   : > { %v1994_v37 = vpop.permute.xlu0 %1993 }
 0x20e   : > { %v2004_v0 = vpop.permute.xlu1 %2003 }
 0x20f   : > { %v2009_v36 = vpop.permute.xlu0 %2008 }
 0x212   : > { %v2014_v62 = vpop.permute.xlu1 %2013 }
 0x213   : > { %v2019_v12 = vpop.permute.xlu0 %2018 }
 0x29e   : > { %v4315_v52 = vpop.f32.mrb[24].mxu1 }
 0x29f   : > { %1866 = vst.msk [vmem:[#allocation2 + $0x10] sm:$0xff] %vm1863_vm8, %v4315_v52  ;;  %v1736_v60 = vpop.f32.mrb[25].mxu1  ;;  %v4857_v52 = vld [vmem:[%s6933_s5 + $0x18] ss:$0 sps:$4 sm:$0xff]  }
 0x2a0   : > { %1864 = vst.msk [vmem:[#allocation2] sm:$0xff] %vm1863_vm8, %v1736_v60  ;;  %v4316_v53 = vpop.f32.mrb[26].mxu1 }
 0x2a1   : > { %1867 = vst.msk [vmem:[#allocation2 + $0x18] sm:$0xff] %vm1863_vm8, %v4316_v53  ;;  %v1739_v45 = vpop.f32.mrb[27].mxu1 }
 0x2a2   : > { %1865 = vst.msk [vmem:[#allocation2 + $0x8] sm:$0xff] %vm1863_vm8, %v1739_v45 }
 0x2a6   : > { %v4319_v9 = vpop.f32.mrb[28].mxu1 }
 0x2a7   : > { %1870 = vst.msk [vmem:[#allocation2 + $0x30] sm:$0xff] %vm1863_vm8, %v4319_v9  ;;  %v1752_v28 = vpop.f32.mrb[29].mxu1 }
 0x2a8   : > { %1868 = vst.msk [vmem:[#allocation2 + $0x20] sm:$0xff] %vm1863_vm8, %v1752_v28  ;;  %v4320_v54 = vpop.f32.mrb[30].mxu1  ;;  %v1898_v61 = vld [vmem:[#allocation2 + $0x10] ss:$2 sm:$0xff]  ;;  %v1930_v43 = vld [vmem:[#allocation2 + $0x11] ss:$2 sm:$0xff] }
 0x2a9   : > { %1871 = vst.msk [vmem:[#allocation2 + $0x38] sm:$0xff] %vm1863_vm8, %v4320_v54  ;;  %v1755_v10 = vpop.f32.mrb[31].mxu1  ;;  %v1960_v46 = vmax.f32 %v1898_v61, %v1930_v43  ;;  %v1896_v31 = vld [vmem:[#allocation2] ss:$2 sm:$0xff]  ;;  %v1928_v19 = vld [vmem:[#allocation2 + $0x1] ss:$2 sm:$0xff] }
 0x2aa   : > { %1869 = vst.msk [vmem:[#allocation2 + $0x28] sm:$0xff] %vm1863_vm8, %v1755_v10  ;;  %v1959_v2 = vmax.f32 %v1896_v31, %v1928_v19  ;;  %v2029_v31 = vpop.permute.xlu0 %2028 }
 0x2ab   : > { %v6288_v33 = vmul.f32 %v1999_v22, %v1960_v46 }
 0x2ac   : > { %v6290_v40 = vmul.f32 %v1994_v37, %v1959_v2  ;;  %v2375_v37 = vsel %vm2228_vm7, %v4857_v52, 0  ;;  %v6368_v2 = vld [vmem:[%s6933_s5 + $0x38] sm:$0xff]  }
 0x2ad   : > { %v2121_v1 = vrot.slane %v6288_v33, 1 }
 0x2ae   : > { %v2120_v8 = vrot.slane %v6290_v40, 1  ;;  %v2175_v24 = vpack.c.bf16 %v6288_v33, %v6290_v40  ;;  %v4323_v25 = vpop.f32.mrb[32].mxu1 }
 0x2af   : > { %1874 = vst.msk [vmem:[#allocation2 + $0x50] sm:$0xff] %vm1863_vm8, %v4323_v25  ;;  %v1768_v39 = vpop.f32.mrb[33].mxu1 }
 0x2b0   : > { %1872 = vst.msk [vmem:[#allocation2 + $0x40] sm:$0xff] %vm1863_vm8, %v1768_v39  ;;  %v1902_v29 = vld [vmem:[#allocation2 + $0x30] ss:$2 sm:$0xff]  ;;  %v1934_v17 = vld [vmem:[#allocation2 + $0x31] ss:$2 sm:$0xff]  ;;  %v4324_v16 = vpop.f32.mrb[34].mxu1  ;;  %4353 = vmatprep.mubr.msk.bf16.mxu1 %vm1863_vm8, %v2175_v24  ;;  %v6303_v32 = vsel %vm481_vm1, %v2120_v8, %v2121_v1 }
 0x2b1   : > { %v1900_v38 = vld [vmem:[#allocation2 + $0x20] ss:$2 sm:$0xff]  ;;  %v1932_v57 = vld [vmem:[#allocation2 + $0x21] ss:$2 sm:$0xff]  ;;  %v1962_v23 = vmax.f32 %v1902_v29, %v1934_v17  ;;  %1875 = vst.msk [vmem:[#allocation2 + $0x58] sm:$0xff] %vm1863_vm8, %v4324_v16  ;;  %v1771_v34 = vpop.f32.mrb[35].mxu1 }
 0x2b2   : > { %v1961_v44 = vmax.f32 %v1900_v38, %v1932_v57  ;;  %1873 = vst.msk [vmem:[#allocation2 + $0x48] sm:$0xff] %vm1863_vm8, %v1771_v34 }
 0x2b3   : > { %v6307_v48 = vmul.f32 %v2009_v36, %v1962_v23 }
 0x2b4   : > { %v6309_v50 = vmul.f32 %v2004_v0, %v1961_v44 }
 0x2b5   : > { %v2123_v51 = vrot.slane %v6307_v48, 1 }
 0x2b6   : > { %v2122_v26 = vrot.slane %v6309_v50, 1  ;;  %v2176_v63 = vpack.c.bf16 %v6307_v48, %v6309_v50  ;;  %v4327_v27 = vpop.f32.mrb[36].mxu1 }
 0x2b7   : > { %1878 = vst.msk [vmem:[#allocation2 + $0x70] sm:$0xff] %vm1863_vm8, %v4327_v27  ;;  %v1784_v18 = vpop.f32.mrb[37].mxu1 }
 0x2b8   : > { %v6321_v6 = vsel %vm481_vm1, %v2122_v26, %v2123_v51  ;;  %v1906_v13 = vld [vmem:[#allocation2 + $0x50] ss:$2 sm:$0xff]  ;;  %v1938_v59 = vld [vmem:[#allocation2 + $0x51] ss:$2 sm:$0xff]  ;;  %1876 = vst.msk [vmem:[#allocation2 + $0x60] sm:$0xff] %vm1863_vm8, %v1784_v18  ;;  %v4328_v49 = vpop.f32.mrb[38].mxu1  ;;  %4354 = vmatmul.mubr.msk.bf16.vlgmr.msra.gmra.mrb[56].mxu1 %vm1863_vm8, %v2176_v63  ;;  %v6327_v47 = vsel %vm481_vm1, %v2121_v1, %v2122_v26  ;;  %v2024_v1 = vpop.permute.xlu1 %2023 }
 0x2b9   : > { %v1904_v55 = vld [vmem:[#allocation2 + $0x40] ss:$2 sm:$0xff]  ;;  %v1936_v56 = vld [vmem:[#allocation2 + $0x41] ss:$2 sm:$0xff]  ;;  %v1964_v58 = vmax.f32 %v1906_v13, %v1938_v59  ;;  %1879 = vst.msk [vmem:[#allocation2 + $0x78] sm:$0xff] %vm1863_vm8, %v4328_v49  ;;  %v1787_v4 = vpop.f32.mrb[39].mxu1  ;;  %4370 = vmatpush3.bf16.msra.mxu1 %v6277_v14  ;;  %v2482_v42 = vpack.c.bf16 %v6327_v47, %v6303_v32 }
 0x2ba   : > { %v1963_v21 = vmax.f32 %v1904_v55, %v1936_v56  ;;  %1877 = vst.msk [vmem:[#allocation2 + $0x68] sm:$0xff] %vm1863_vm8, %v1787_v4  ;;  %4371 = vmatprep.subr.bf16.mxu1 %v4855_v35 }
 0x2bb   : > { %v6337_v3 = vmul.f32 %v2019_v12, %v1964_v58 }
 0x2bc   : > { %v6339_v15 = vmul.f32 %v2014_v62, %v1963_v21  ;;  %v2034_v13 = vpop.permute.xlu1 %2033 }
 0x2bd   : > { %v2125_v30 = vrot.slane %v6337_v3, 1  ;;  %4372 = vmatpush3.bf16.msra.mxu1 %v4855_v35  ;;  %v2039_v35 = vpop.permute.xlu0 %2038 }
 0x2be   : > { %v2124_v41 = vrot.slane %v6339_v15, 1  ;;  %v2177_v11 = vpack.c.bf16 %v6337_v3, %v6339_v15  ;;  %v4331_v14 = vpop.f32.mrb[40].mxu1  ;;  %4373 = vmatprep.subr.bf16.mxu1 %v4856_v7 }
 0x2bf   : > { %1882 = vst.msk [vmem:[#allocation2 + $0x90] sm:$0xff] %vm1863_vm8, %v4331_v14  ;;  %v1800_v60 = vpop.f32.mrb[41].mxu1 }
 0x2c0   : > { %v6351_v53 = vsel %vm481_vm1, %v2123_v51, %v2124_v41  ;;  %1880 = vst.msk [vmem:[#allocation2 + $0x80] sm:$0xff] %vm1863_vm8, %v1800_v60  ;;  %v4332_v45 = vpop.f32.mrb[42].mxu1  ;;  %4357 = vmatprep.mubr.msk.bf16.mxu1 %vm1863_vm8, %v2177_v11  ;;  %v1910_v9 = vld [vmem:[#allocation2 + $0x70] ss:$2 sm:$0xff]  ;;  %v1942_v28 = vld [vmem:[#allocation2 + $0x71] ss:$2 sm:$0xff]  ;;  %v6357_v54 = vsel %vm481_vm1, %v2124_v41, %v2125_v30 }
 0x2c1   : > { %v2483_v61 = vpack.c.bf16 %v6351_v53, %v6321_v6  ;;  %1883 = vst.msk [vmem:[#allocation2 + $0x98] sm:$0xff] %vm1863_vm8, %v4332_v45  ;;  %v1803_v43 = vpop.f32.mrb[43].mxu1  ;;  %v1908_v22 = vld [vmem:[#allocation2 + $0x60] ss:$2 sm:$0xff]  ;;  %v1940_v10 = vld [vmem:[#allocation2 + $0x61] ss:$2 sm:$0xff]  ;;  %v1966_v46 = vmax.f32 %v1910_v9, %v1942_v28  ;;  %4374 = vmatpush3.bf16.msra.mxu1 %v4856_v7  ;;  %v2049_v9 = vpop.permute.xlu0 %2048 }
 0x2c2   : > { %1881 = vst.msk [vmem:[#allocation2 + $0x88] sm:$0xff] %vm1863_vm8, %v1803_v43  ;;  %v1965_v19 = vmax.f32 %v1908_v22, %v1940_v10  ;;  %4669 = vmatprep.subr.msk.bf16.mxu1 %vm2228_vm7, %v4857_v52  ;;  %v2044_v43 = vpop.permute.xlu1 %2043 }
 0x2c3   : > { %v6370_v24 = vmul.f32 %v2029_v31, %v1966_v46 }
 0x2c4   : > { %v6372_v25 = vmul.f32 %v2024_v1, %v1965_v19 }
 0x2c5   : > { %4376 = vmatpush3.bf16.msra.mxu1 %v2375_v37  ;;  %v2127_v39 = vrot.slane %v6370_v24, 1 }
 0x2c6   : > { %v4335_v29 = vpop.f32.mrb[44].mxu1  ;;  %v2178_v17 = vpack.c.bf16 %v6370_v24, %v6372_v25  ;;  %4393 = vmatprep.subr.bf16.mxu1 %v6368_v2  ;;  %v2126_v16 = vrot.slane %v6372_v25, 1 }
 0x2c7   : > { %1886 = vst.msk [vmem:[#allocation2 + $0xb0] sm:$0xff] %vm1863_vm8, %v4335_v29  ;;  %v1816_v38 = vpop.f32.mrb[45].mxu1 }
 0x2c8   : > { %1884 = vst.msk [vmem:[#allocation2 + $0xa0] sm:$0xff] %vm1863_vm8, %v1816_v38  ;;  %v4336_v57 = vpop.f32.mrb[46].mxu1  ;;  %4358 = vmatmul.mubr.msk.bf16.gmra.mrb[60].mxu1 %vm1863_vm8, %v2178_v17  ;;  %v1914_v23 = vld [vmem:[#allocation2 + $0x90] ss:$2 sm:$0xff]  ;;  %v1946_v34 = vld [vmem:[#allocation2 + $0x91] ss:$2 sm:$0xff]  ;;  %v6384_v44 = vsel %vm481_vm1, %v2125_v30, %v2126_v16  ;;  %v6388_v36 = vsel %vm481_vm1, %v2126_v16, %v2127_v39 }
 0x2c9   : > { %1887 = vst.msk [vmem:[#allocation2 + $0xb8] sm:$0xff] %vm1863_vm8, %v4336_v57  ;;  %v1819_v0 = vpop.f32.mrb[47].mxu1  ;;  %v1912_v51 = vld [vmem:[#allocation2 + $0x80] ss:$2 sm:$0xff]  ;;  %v1944_v26 = vld [vmem:[#allocation2 + $0x81] ss:$2 sm:$0xff]  ;;  %v1968_v63 = vmax.f32 %v1914_v23, %v1946_v34  ;;  %v2484_v27 = vpack.c.bf16 %v6384_v44, %v6357_v54 }
 0x2ca   : > { %1885 = vst.msk [vmem:[#allocation2 + $0xa8] sm:$0xff] %vm1863_vm8, %v1819_v0  ;;  %v1967_v18 = vmax.f32 %v1912_v51, %v1944_v26  ;;  %v2059_v0 = vpop.permute.xlu0 %2058  ;;  %v2054_v26 = vpop.permute.xlu1 %2053 }
 0x2cb   : > { %v6394_v59 = vmul.f32 %v2039_v35, %v1968_v63 }
 0x2cc   : > { %v6396_v49 = vmul.f32 %v2034_v13, %v1967_v18 }
 0x2cd   : > { %v2129_v55 = vrot.slane %v6394_v59, 1 }
 0x2ce   : > { %v4339_v56 = vpop.f32.mrb[48].mxu1  ;;  %v2179_v58 = vpack.c.bf16 %v6394_v59, %v6396_v49  ;;  %v2128_v4 = vrot.slane %v6396_v49, 1 }
 0x2cf   : > { %1890 = vst.msk [vmem:[#allocation2 + $0xd0] sm:$0xff] %vm1863_vm8, %v4339_v56  ;;  %v1832_v21 = vpop.f32.mrb[49].mxu1 }
 0x2d0   : > { %1888 = vst.msk [vmem:[#allocation2 + $0xc0] sm:$0xff] %vm1863_vm8, %v1832_v21  ;;  %v4340_v12 = vpop.f32.mrb[50].mxu1  ;;  %4361 = vmatprep.mubr.msk.bf16.mxu1 %vm1863_vm8, %v2179_v58  ;;  %v1918_v7 = vld [vmem:[#allocation2 + $0xb0] ss:$2 sm:$0xff]  ;;  %v1950_v62 = vld [vmem:[#allocation2 + $0xb1] ss:$2 sm:$0xff]  ;;  %v6407_v30 = vsel %vm481_vm1, %v2127_v39, %v2128_v4  ;;  %v6411_v41 = vsel %vm481_vm1, %v2128_v4, %v2129_v55  ;;  %v2069_v21 = vpop.permute.xlu0 %2068 }
 0x2d1   : > { %1891 = vst.msk [vmem:[#allocation2 + $0xd8] sm:$0xff] %vm1863_vm8, %v4340_v12  ;;  %v1835_v11 = vpop.f32.mrb[51].mxu1  ;;  %v1916_v14 = vld [vmem:[#allocation2 + $0xa0] ss:$2 sm:$0xff]  ;;  %v1948_v52 = vld [vmem:[#allocation2 + $0xa1] ss:$2 sm:$0xff]  ;;  %v1970_v60 = vmax.f32 %v1918_v7, %v1950_v62  ;;  %v2485_v45 = vpack.c.bf16 %v6407_v30, %v6388_v36 }
 0x2d2   : > { %1889 = vst.msk [vmem:[#allocation2 + $0xc8] sm:$0xff] %vm1863_vm8, %v1835_v11  ;;  %v1969_v28 = vmax.f32 %v1916_v14, %v1948_v52  ;;  %v2088_v7 = vrot.slane %v6288_v33, 7  ;;  %v2087_v62 = vrot.slane %v6290_v40, 7  ;;  %v2064_v11 = vpop.permute.xlu1 %2063  ;;  %v4864_v40 = vld [vmem:[%s6935_s7 + $0x10] sm:$0xff]  }
 0x2d3   : > { %v6417_v22 = vmul.f32 %v2049_v9, %v1970_v60 }
 0x2d4   : > { %v6419_v10 = vmul.f32 %v2044_v43, %v1969_v28  ;;  %v2089_v28 = vrot.slane %v6309_v50, 7  ;;  %v2090_v43 = vrot.slane %v6307_v48, 7  ;;  %v2118_v33 = vsel %vm2103_vm9, %v2087_v62, %v2088_v7 }
 0x2d5   : > { %v2131_v6 = vrot.slane %v6417_v22, 1 }
 0x2d6   : > { %v4343_v46 = vpop.f32.mrb[52].mxu1  ;;  %v2180_v31 = vpack.c.bf16 %v6417_v22, %v6419_v10  ;;  %v2130_v19 = vrot.slane %v6419_v10, 1  ;;  %v2117_v50 = vsel %vm2103_vm9, %v2088_v7, %v2089_v28  ;;  %v2116_v48 = vsel %vm2103_vm9, %v2089_v28, %v2090_v43 }
 0x2d7   : > { %1894 = vst.msk [vmem:[#allocation2 + $0xf0] sm:$0xff] %vm1863_vm8, %v4343_v46  ;;  %v1848_v37 = vpop.f32.mrb[53].mxu1 }
 0x2d8   : > { %1892 = vst.msk [vmem:[#allocation2 + $0xe0] sm:$0xff] %vm1863_vm8, %v1848_v37  ;;  %v4344_v1 = vpop.f32.mrb[54].mxu1  ;;  %4362 = vmatmul.mubr.msk.bf16.gmra.mrb[64].mxu1 %vm1863_vm8, %v2180_v31  ;;  %v1922_v39 = vld [vmem:[#allocation2 + $0xd0] ss:$2 sm:$0xff]  ;;  %v1954_v29 = vld [vmem:[#allocation2 + $0xd1] ss:$2 sm:$0xff]  ;;  %v6431_v17 = vsel %vm481_vm1, %v2129_v55, %v2130_v19  ;;  %v2140_v54 = vsel %vm481_vm1, %v2130_v19, %v2131_v6 }
 0x2d9   : > { %1895 = vst.msk [vmem:[#allocation2 + $0xf8] sm:$0xff] %vm1863_vm8, %v4344_v1  ;;  %v1851_v16 = vpop.f32.mrb[55].mxu1  ;;  %v1920_v38 = vld [vmem:[#allocation2 + $0xc0] ss:$2 sm:$0xff]  ;;  %v1952_v57 = vld [vmem:[#allocation2 + $0xc1] ss:$2 sm:$0xff]  ;;  %v1972_v23 = vmax.f32 %v1922_v39, %v1954_v29  ;;  %v2486_v34 = vpack.c.bf16 %v6431_v17, %v6411_v41 }
 0x2da   : > { %1893 = vst.msk [vmem:[#allocation2 + $0xe8] sm:$0xff] %vm1863_vm8, %v1851_v16  ;;  %v1971_v51 = vmax.f32 %v1920_v38, %v1952_v57  ;;  %v2091_v31 = vrot.slane %v6339_v15, 7  ;;  %v2092_v37 = vrot.slane %v6337_v3, 7  ;;  %v2160_v15 = vpack.c.bf16 %v2116_v48, %v2117_v50  ;;  %v4859_v3 = vld [vmem:[%s6933_s5 + $0x40] sm:$0xff]   ;;  %v4867_v19 = vld [vmem:[%s6935_s7 + $0x28] sm:$0xff]   ;;  %v4868_v17 = vld [vmem:[%s6935_s7 + $0x30] sm:$0xff]  }
 0x2db   : > { %v6437_v63 = vmul.f32 %v2059_v0, %v1972_v23  ;;  %v2093_v38 = vrot.slane %v6372_v25, 7  ;;  %v2094_v57 = vrot.slane %v6370_v24, 7  ;;  %v2095_v23 = vrot.slane %v6396_v49, 7 }
 0x2dc   : > { %v6439_v35 = vmul.f32 %v2054_v26, %v1971_v51  ;;  %v2114_v39 = vsel %vm2103_vm9, %v2091_v31, %v2092_v37  ;;  %v2115_v29 = vsel %vm2103_vm9, %v2090_v43, %v2091_v31  ;;  %v2096_v0 = vrot.slane %v6394_v59, 7  ;;  %v4860_v51 = vld [vmem:[%s6933_s5 + $0x48] sm:$0xff]   ;;  %v4861_v26 = vld [vmem:[%s6933_s5 + $0x50] ss:$0 sps:$4 sm:$0xff]  }
 0x2dd   : > { %v2161_v16 = vpack.c.bf16 %v2114_v39, %v2115_v29  ;;  %v2112_v25 = vsel %vm2103_vm9, %v2093_v38, %v2094_v57  ;;  %v2113_v24 = vsel %vm2103_vm9, %v2092_v37, %v2093_v38  ;;  %v2111_v59 = vsel %vm2103_vm9, %v2094_v57, %v2095_v23 }
 0x2de   : > { %v2181_v18 = vpack.c.bf16 %v6437_v63, %v6439_v35  ;;  %v2110_v49 = vsel %vm2103_vm9, %v2095_v23, %v2096_v0  ;;  %v2133_v47 = vrot.slane %v6437_v63, 1 }
 0x2e0   : > { %4365 = vmatprep.mubr.msk.bf16.mxu1 %vm1863_vm8, %v2181_v18  ;;  %v1926_v13 = vld [vmem:[#allocation2 + $0xf0] ss:$2 sm:$0xff]  ;;  %v1958_v55 = vld [vmem:[#allocation2 + $0xf1] ss:$2 sm:$0xff]  ;;  %v2163_v18 = vpack.c.bf16 %v2110_v49, %v2111_v59 }
 0x2e1   : > { %v1924_v56 = vld [vmem:[#allocation2 + $0xe0] ss:$2 sm:$0xff]  ;;  %v1956_v58 = vld [vmem:[#allocation2 + $0xe1] ss:$2 sm:$0xff]  ;;  %v1974_v4 = vmax.f32 %v1926_v13, %v1958_v55  ;;  %v2097_v13 = vrot.slane %v6419_v10, 7  ;;  %v2098_v55 = vrot.slane %v6417_v22, 7 }
 0x2e2   : > { %v1973_v12 = vmax.f32 %v1924_v56, %v1956_v58  ;;  %v2099_v56 = vrot.slane %v6439_v35, 7  ;;  %v2100_v58 = vrot.slane %v6437_v63, 7  ;;  %v4862_v22 = vld [vmem:[%s6935_s7] sm:$0xff]   ;;  %v4863_v10 = vld [vmem:[%s6935_s7 + $0x8] sm:$0xff]   ;;  %v2858_v63 = vand.u32 %v4868_v17, %v5897_v20 }
 0x2e3   : > { %v6446_v14 = vmul.f32 %v2069_v21, %v1974_v4  ;;  %v2536_v4 = vsel %vm2228_vm7, %v4861_v26, 0  ;;  %v2108_v21 = vsel %vm2103_vm9, %v2097_v13, %v2098_v55 }
 0x2e4   : > { %v6449_v52 = vmul.f32 %v2064_v11, %v1973_v12  ;;  %v2109_v12 = vsel %vm2103_vm9, %v2096_v0, %v2097_v13  ;;  %v2106_v7 = vsel %vm2103_vm9, %v2099_v56, %v2100_v58 }
 0x2e5   : > { %v2102_v60 = vrot.slane %v6446_v14, 7  ;;  %v2164_v11 = vpack.c.bf16 %v2108_v21, %v2109_v12 }
 0x2e6   : > { %v2182_v9 = vpack.c.bf16 %v6446_v14, %v6449_v52  ;;  %v2101_v28 = vrot.slane %v6449_v52, 7  ;;  %v2134_v32 = vrot.slane %v6449_v52, 1 }
 0x2e7   : > { %v2119_v46 = vsel %vm2103_vm9, %v2102_v60, %v2087_v62  ;;  %v2107_v62 = vsel %vm2103_vm9, %v2098_v55, %v2099_v56 }
 0x2e8   : > { %4366 = vmatmul.mubr.msk.bf16.gmra.mrb[68].mxu1 %vm1863_vm8, %v2182_v9  ;;  %v2159_v1 = vpack.c.bf16 %v2118_v33, %v2119_v46  ;;  %v2165_v9 = vpack.c.bf16 %v2106_v7, %v2107_v62  ;;  %v2104_v43 = vsel %vm2103_vm9, %v2101_v28, %v2102_v60  ;;  %v2105_v33 = vsel %vm2103_vm9, %v2100_v58, %v2101_v28 }
 0x2e9   : > { %v2166_v46 = vpack.c.bf16 %v2104_v43, %v2105_v33  ;;  %v2132_v60 = vrot.slane %v6439_v35, 1  ;;  %v2137_v53 = vsel %vm481_vm1, %v2133_v47, %v2134_v32 }
 0x2ea   : > { %4377 = vmatprep.mubr.msk.bf16.mxu1 %vm1863_vm8, %v2159_v1 }
 0x2eb   : > { %v2138_v44 = vsel %vm481_vm1, %v2132_v60, %v2133_v47 }
 0x2ec   : > { %v2488_v36 = vpack.c.bf16 %v2137_v53, %v2138_v44 }
 0x2f0   : > { %4378 = vmatmul.mubr.msk.bf16.vlgmr.msra.gmra.mrb[56].mxu1 %vm1863_vm8, %v2160_v15 }
 0x2f1   : > { %4394 = vmatpush3.bf16.msra.mxu1 %v6368_v2  ;;  %4381 = vmatprep.mubr.msk.bf16.mxu1 %vm1863_vm8, %v2161_v16  ;;  %v2162_v2 = vpack.c.bf16 %v2112_v25, %v2113_v24 }
 0x2f2   : > { %4395 = vmatprep.subr.bf16.mxu1 %v4859_v3 }
 0x2f5   : > { %4396 = vmatpush3.bf16.msra.mxu1 %v4859_v3 }
 0x2f6   : > { %4397 = vmatprep.subr.bf16.mxu1 %v4860_v51 }
 0x2f8   : > { %4382 = vmatmul.mubr.msk.bf16.gmra.mrb[60].mxu1 %vm1863_vm8, %v2162_v2 }
 0x2f9   : > { %4385 = vmatprep.mubr.msk.bf16.mxu1 %vm1863_vm8, %v2163_v18  ;;  %4398 = vmatpush3.bf16.msra.mxu1 %v4860_v51 }
 0x2fa   : > { %4670 = vmatprep.subr.msk.bf16.mxu1 %vm2228_vm7, %v4861_v26 }
 0x2fd   : > { %4400 = vmatpush3.bf16.msra.mxu1 %v2536_v4 }
 0x2fe   : > { %4417 = vmatprep.subr.bf16.mxu1 %v4862_v22 }
 0x300   : > { %4386 = vmatmul.mubr.msk.bf16.gmra.mrb[64].mxu1 %vm1863_vm8, %v2164_v11 }
 0x301   : > { %4389 = vmatprep.mubr.msk.bf16.mxu1 %vm1863_vm8, %v2165_v9 }
 0x308   : > { %4390 = vmatmul.mubr.msk.bf16.gmra.mrb[68].mxu1 %vm1863_vm8, %v2166_v46 }
 0x309   : > { %4401 = vmatprep.mubr.msk.bf16.mxu1 %vm1863_vm8, %v2482_v42  ;;  %v2139_v42 = vsel %vm481_vm1, %v2131_v6, %v2132_v60 }
 0x310   : > { %4402 = vmatmul.mubr.msk.bf16.vlgmr.msra.gmra.mrb[56].mxu1 %vm1863_vm8, %v2483_v61  ;;  %v2487_v61 = vpack.c.bf16 %v2139_v42, %v2140_v54 }
 0x311   : > { %4405 = vmatprep.mubr.msk.bf16.mxu1 %vm1863_vm8, %v2484_v27  ;;  %v2135_v27 = vrot.slane %v6446_v14, 1  ;;  %4418 = vmatpush3.bf16.msra.mxu1 %v4862_v22 }
 0x312   : > { %4419 = vmatprep.subr.bf16.mxu1 %v4863_v10 }
 0x313   : > { %v2136_v30 = vsel %vm481_vm1, %v2134_v32, %v2135_v27  ;;  %v2151_v41 = vsel %vm481_vm1, %v2135_v27, %v2120_v8  ;;  %v4866_v8 = vld [vmem:[%s6935_s7 + $0x20] sm:$0xff]  }
 0x315   : > { %4420 = vmatpush3.bf16.msra.mxu1 %v4863_v10  ;;  %v4870_v10 = vld [vmem:[%s6936_s8 + $0x8] sm:$0xff]  }
 0x316   : > { %4421 = vmatprep.subr.bf16.mxu1 %v4864_v40 }
 0x318   : > { %4406 = vmatmul.mubr.msk.bf16.gmra.mrb[60].mxu1 %vm1863_vm8, %v2485_v45  ;;  %v2489_v45 = vpack.c.bf16 %v2151_v41, %v2136_v30  ;;  %v4966_v41 = vmov 0.0  }
 0x319   : > { %4409 = vmatprep.mubr.msk.bf16.mxu1 %vm1863_vm8, %v2486_v34  ;;  %4422 = vmatpush3.bf16.msra.mxu1 %v4864_v40  ;;  %v3923_v34 = vld [vmem:[%s6934_s6] ss:$0 sm:$0xff] }
 0x31a   : > { %4423 = vmatprep.subr.bf16.mxu1 %v4865_v5  ;;  %4447 = vmatprep.subr.bf16.mxu0 %v4966_v41 }
 0x31b   : > { %4455 = vmatprep.mubr.msk.bf16.mxu0 %vm4967_vm10, %v4966_v41 }
 0x31d   : > { %4424 = vmatpush3.bf16.msra.mxu1 %v4865_v5 }
 0x31e   : > { %4425 = vmatprep.subr.bf16.mxu1 %v4866_v8 }
 0x320   : > { %4410 = vmatmul.mubr.msk.bf16.gmra.mrb[64].mxu1 %vm1863_vm8, %v2487_v61 }
 0x321   : > { %4413 = vmatprep.mubr.msk.bf16.mxu1 %vm1863_vm8, %v2488_v36  ;;  %4426 = vmatpush3.bf16.msra.mxu1 %v4866_v8  ;;  %v4869_v36 = vld [vmem:[%s6936_s8] sm:$0xff]  }
 0x322   : > { %4427 = vmatprep.subr.bf16.mxu1 %v4867_v19  ;;  %4448 = vmatpush3.bf16.msra.mxu0 %v4869_v36 }
 0x323   : > { %4449 = vmatprep.subr.bf16.mxu0 %v4966_v41 }
 0x325   : > { %4428 = vmatpush3.bf16.msra.mxu1 %v4867_v19 }
 0x326   : > { %4429 = vmatprep.subr.bf16.mxu1 %v2858_v63  ;;  %4450 = vmatpush3.bf16.msra.mxu0 %v4870_v10 }
 0x327   : > { %4451 = vmatprep.subr.bf16.mxu0 %v4966_v41 }
 0x328   : > { %4414 = vmatmul.mubr.msk.bf16.gmra.mrb[68].mxu1 %vm1863_vm8, %v2489_v45 }
 0x329   : > { %4430 = vmatpush3.bf16.msra.mxu1 %v2858_v63 }
 0x32a   : > { %4531 = vmatprep.subr.bf16.mxu1 %v4966_v41 }
 0x3e3   : > { %v4403_v35 = vpop.f32.mrb[56].mxu1 }
 0x3e4   : > { %v6589_v14 = vadd.f32 %v4403_v35, %v3923_v34  ;;  %v2572_v52 = vpop.f32.mrb[57].mxu1 }
 0x3e5   : > { %v6591_v31 = vadd.f32 %v3923_v34, %v2572_v52  ;;  %v4404_v37 = vpop.f32.mrb[58].mxu1 }
 0x3e6   : > { %v6593_v1 = vadd.f32 %v4404_v37, %v3923_v34  ;;  %v2575_v50 = vpop.f32.mrb[59].mxu1  ;;  %v2676_v39 = vmax.f32 %v6589_v14, 0.0 }
 0x3e7   : > { %v6595_v48 = vadd.f32 %v3923_v34, %v2575_v50  ;;  %v2674_v20 = vmax.f32 %v6591_v31, 0.0 }
 0x3e8   : > { %v2677_v29 = vmax.f32 %v6593_v1, 0.0 }
 0x3e9   : > { %v2675_v15 = vmax.f32 %v6595_v48, 0.0 }
 0x3ea   : > { %v4802_v3 = vpack.i.bf16 %v2677_v29, %v2676_v39 }
 0x3eb   : > { %v4797_v16 = vpack.i.bf16 %v2675_v15, %v2674_v20  ;;  %v4407_v38 = vpop.f32.mrb[60].mxu1 }
 0x3ec   : > { %v6609_v57 = vadd.f32 %v4407_v38, %v3923_v34  ;;  %4803 = vrot.lane.b32.xlu0 %v4802_v3, %s7049_s15  ;;  %v2588_v23 = vpop.f32.mrb[61].mxu1 }
 0x3ed   : > { %v6612_v0 = vadd.f32 %v3923_v34, %v2588_v23  ;;  %4798 = vrot.lane.b32.xlu1 %v4797_v16, %s7049_s15  ;;  %v4408_v51 = vpop.f32.mrb[62].mxu1 }
 0x3ee   : > { %v6615_v25 = vadd.f32 %v4408_v51, %v3923_v34  ;;  %v2591_v24 = vpop.f32.mrb[63].mxu1  ;;  %v2680_v59 = vmax.f32 %v6609_v57, 0.0 }
 0x3ef   : > { %v6617_v49 = vadd.f32 %v3923_v34, %v2591_v24  ;;  %v2678_v26 = vmax.f32 %v6612_v0, 0.0 }
 0x3f0   : > { %v2681_v2 = vmax.f32 %v6615_v25, 0.0 }
 0x3f1   : > { %v2679_v18 = vmax.f32 %v6617_v49, 0.0 }
 0x3f2   : > { %v4812_v13 = vpack.i.bf16 %v2681_v2, %v2680_v59 }
 0x3f3   : > { %v4807_v55 = vpack.i.bf16 %v2679_v18, %v2678_v26  ;;  %v4411_v56 = vpop.f32.mrb[64].mxu1 }
 0x3f4   : > { %v6631_v58 = vadd.f32 %v4411_v56, %v3923_v34  ;;  %4813 = vrot.lane.b32.xlu0 %v4812_v13, %s7049_s15  ;;  %v2604_v4 = vpop.f32.mrb[65].mxu1 }
 0x3f5   : > { %v6634_v21 = vadd.f32 %v3923_v34, %v2604_v4  ;;  %4808 = vrot.lane.b32.xlu1 %v4807_v55, %s7049_s15  ;;  %v4412_v12 = vpop.f32.mrb[66].mxu1 }
 0x3f6   : > { %v6637_v7 = vadd.f32 %v4412_v12, %v3923_v34  ;;  %v2607_v62 = vpop.f32.mrb[67].mxu1  ;;  %v2684_v9 = vmax.f32 %v6631_v58, 0.0 }
 0x3f7   : > { %v6639_v11 = vadd.f32 %v3923_v34, %v2607_v62  ;;  %v2682_v43 = vmax.f32 %v6634_v21, 0.0 }
 0x3f8   : > { %v2685_v28 = vmax.f32 %v6637_v7, 0.0 }
 0x3f9   : > { %v2683_v33 = vmax.f32 %v6639_v11, 0.0 }
 0x3fa   : > { %v4822_v46 = vpack.i.bf16 %v2685_v28, %v2684_v9 }
 0x3fb   : > { %v4817_v60 = vpack.i.bf16 %v2683_v33, %v2682_v43  ;;  %v4415_v32 = vpop.f32.mrb[68].mxu1 }
 0x3fc   : > { %v6653_v6 = vadd.f32 %v4415_v32, %v3923_v34  ;;  %4823 = vrot.lane.b32.xlu0 %v4822_v46, %s7049_s15  ;;  %v2620_v47 = vpop.f32.mrb[69].mxu1 }
 0x3fd   : > { %v6656_v42 = vadd.f32 %v3923_v34, %v2620_v47  ;;  %4818 = vrot.lane.b32.xlu1 %v4817_v60, %s7049_s15  ;;  %v4416_v53 = vpop.f32.mrb[70].mxu1  ;;  %v4871_v47 = vld [vmem:[%s6936_s8 + $0x10] sm:$0xff]  }
 0x3fe   : > { %v6659_v54 = vadd.f32 %v4416_v53, %v3923_v34  ;;  %v2623_v61 = vpop.f32.mrb[71].mxu1  ;;  %v2688_v27 = vmax.f32 %v6653_v6, 0.0  ;;  %4452 = vmatpush3.bf16.msra.mxu0 %v4871_v47  ;;  %v4872_v6 = vld [vmem:[%s6936_s8 + $0x18] ss:$0 sps:$4 sm:$0xff]  }
 0x3ff   : > { %v6661_v44 = vadd.f32 %v3923_v34, %v2623_v61  ;;  %v2686_v45 = vmax.f32 %v6656_v42, 0.0  ;;  %4453 = vmatprep.subr.bf16.mxu0 %v4966_v41  ;;  %v3023_v42 = vsel %vm2228_vm7, %v4872_v6, 0 }
 0x400   : > { %v2689_v30 = vmax.f32 %v6659_v54, 0.0 }
 0x401   : > { %v2687_v22 = vmax.f32 %v6661_v44, 0.0 }
 0x402   : > { %v4832_v40 = vpack.i.bf16 %v2689_v30, %v2688_v27  ;;  %4454 = vmatpush3.bf16.msra.mxu0 %v3023_v42 }
 0x403   : > { %v4827_v5 = vpack.i.bf16 %v2687_v22, %v2686_v45  ;;  %4459 = vmatprep.subr.bf16.mxu0 %v4966_v41 }
 0x404   : > { %4833 = vrot.lane.b32.xlu0 %v4832_v40, %s7049_s15 }
 0x405   : > { %4828 = vrot.lane.b32.xlu1 %v4827_v5, %s7049_s15  ;;  %s4905_s15 = scalar_lea.vmem %s4904_s0, 256 }
 0x406   : > { %p4907_p1 = scmp.lt.s32.totalorder %s4905_s15, %s4899_s19 }
 0x408   : > { %p4908_p2 = por %p4907_p1, %p4906_p0 }
 0x40a   : > { %p4909_p3 = pnand %p4908_p2, %p4902_p13 }
 0x45e   : > { %v4804_v8 = vpop.permute.xlu0 %4803 }
 0x45f   : > { %v4806_v19 = vunpack.i.h.bf16 %v4804_v8  ;;  %v4805_v17 = vunpack.i.l.bf16 %v4804_v8  ;;  %v4799_v34 = vpop.permute.xlu1 %4798 }
 0x460   : > { %v4801_v63 = vunpack.i.h.bf16 %v4799_v34  ;;  %v4800_v35 = vunpack.i.l.bf16 %v4799_v34 }
 0x461   : > { %v2757_v52 = vmax.f32 %v2677_v29, %v4806_v19  ;;  %v2756_v37 = vmax.f32 %v2676_v39, %v4805_v17 }
 0x462   : > { %v2755_v50 = vmax.f32 %v2675_v15, %v4801_v63  ;;  %v2754_v3 = vmax.f32 %v2674_v20, %v4800_v35 }
 0x463   : > { %v2785_v38 = vpack.c.bf16 %v2757_v52, %v2756_v37 }
 0x464   : > { %v2784_v16 = vpack.c.bf16 %v2755_v50, %v2754_v3 }
 0x466   : > { %4431 = vmatprep.mubr.msk.bf16.mxu1 %vm1646_vm6, %v2784_v16  ;;  %v4814_v23 = vpop.permute.xlu0 %4813 }
 0x467   : > { %v4816_v51 = vunpack.i.h.bf16 %v4814_v23  ;;  %v4815_v24 = vunpack.i.l.bf16 %v4814_v23  ;;  %4432 = vmatmul.mubr.msk.bf16.vlgmr.msra.gmra.mrb[72].mxu1 %vm1646_vm6, %v2785_v38  ;;  %v4809_v1 = vpop.permute.xlu1 %4808 }
 0x468   : > { %v4811_v29 = vunpack.i.h.bf16 %v4809_v1  ;;  %v4810_v13 = vunpack.i.l.bf16 %v4809_v1 }
 0x469   : > { %v2761_v14 = vmax.f32 %v2681_v2, %v4816_v51  ;;  %v2760_v48 = vmax.f32 %v2680_v59, %v4815_v24 }
 0x46a   : > { %v2759_v31 = vmax.f32 %v2679_v18, %v4811_v29  ;;  %v2758_v39 = vmax.f32 %v2678_v26, %v4810_v13 }
 0x46b   : > { %v2787_v15 = vpack.c.bf16 %v2761_v14, %v2760_v48 }
 0x46c   : > { %v2786_v20 = vpack.c.bf16 %v2759_v31, %v2758_v39  ;;  %v4873_v39 = vld [vmem:[%s6936_s8 + $0x1c] sm:$0xff]  }
 0x46e   : > { %4435 = vmatprep.mubr.msk.bf16.mxu1 %vm1646_vm6, %v2786_v20  ;;  %v4824_v55 = vpop.permute.xlu0 %4823 }
 0x46f   : > { %v4826_v56 = vunpack.i.h.bf16 %v4824_v55  ;;  %v4825_v4 = vunpack.i.l.bf16 %v4824_v55  ;;  %4436 = vmatmul.mubr.msk.bf16.gmra.mrb[76].mxu1 %vm1646_vm6, %v2787_v15  ;;  %v4819_v25 = vpop.permute.xlu1 %4818  ;;  %v4874_v15 = vld [vmem:[%s6936_s8 + $0x24] sm:$0xff]  }
 0x470   : > { %v4821_v2 = vunpack.i.h.bf16 %v4819_v25  ;;  %v4820_v12 = vunpack.i.l.bf16 %v4819_v25 }
 0x471   : > { %v2765_v57 = vmax.f32 %v2685_v28, %v4826_v56  ;;  %v2764_v49 = vmax.f32 %v2684_v9, %v4825_v4 }
 0x472   : > { %v2763_v0 = vmax.f32 %v2683_v33, %v4821_v2  ;;  %v2762_v59 = vmax.f32 %v2682_v43, %v4820_v12 }
 0x473   : > { %v2789_v18 = vpack.c.bf16 %v2765_v57, %v2764_v49 }
 0x474   : > { %v2788_v26 = vpack.c.bf16 %v2763_v0, %v2762_v59 }
 0x476   : > { %4439 = vmatprep.mubr.msk.bf16.mxu1 %vm1646_vm6, %v2788_v26  ;;  %v4834_v62 = vpop.permute.xlu0 %4833 }
 0x477   : > { %v4836_v46 = vunpack.i.h.bf16 %v4834_v62  ;;  %v4835_v60 = vunpack.i.l.bf16 %v4834_v62  ;;  %4440 = vmatmul.mubr.msk.bf16.gmra.mrb[80].mxu1 %vm1646_vm6, %v2789_v18  ;;  %v4829_v7 = vpop.permute.xlu1 %4828  ;;  %v4875_v62 = vld [vmem:[%s6936_s8 + $0x2c] sm:$0xff]  }
 0x478   : > { %v4831_v28 = vunpack.i.h.bf16 %v4829_v7  ;;  %v4830_v32 = vunpack.i.l.bf16 %v4829_v7 }
 0x479   : > { %v2769_v58 = vmax.f32 %v2689_v30, %v4836_v46  ;;  %v2768_v11 = vmax.f32 %v2688_v27, %v4835_v60  ;;  %v4897_v27 = vld [vmem:[%s6938_s10] sm:$0xff]   ;;  %v4876_v46 = vld [vmem:[%s6936_s8 + $0x34] ss:$0 sps:$4 sm:$0xff]  }
 0x47a   : > { %v2767_v21 = vmax.f32 %v2687_v22, %v4831_v28  ;;  %v2766_v9 = vmax.f32 %v2686_v45, %v4830_v32  ;;  %4532 = vmatpush3.bf16.msra.mxu1 %v4897_v27  ;;  %v4898_v22 = vld [vmem:[%s6938_s10 + $0x8] sm:$0xff]   ;;  %v3123_v28 = vsel %vm2228_vm7, %v4876_v46, 0 }
 0x47b   : > { %v2791_v33 = vpack.c.bf16 %v2769_v58, %v2768_v11  ;;  %4533 = vmatprep.subr.bf16.mxu1 %v4966_v41  ;;  %v4877_v58 = vld [vmem:[%s6936_s8 + $0x38] sm:$0xff]   ;;  %v4888_v46 = vld [vmem:[%s6936_s8 + $0x88] ss:$0 sps:$4 sm:$0xff]  }
 0x47c   : > { %v2790_v43 = vpack.c.bf16 %v2767_v21, %v2766_v9  ;;  %v4878_v21 = vld [vmem:[%s6936_s8 + $0x40] sm:$0xff]  }
 0x47e   : > { %4443 = vmatprep.mubr.msk.bf16.mxu1 %vm1646_vm6, %v2790_v43  ;;  %4534 = vmatpush3.bf16.msra.mxu1 %v4898_v22 }
 0x47f   : > { %4444 = vmatmul.mubr.msk.bf16.gmra.mrb[84].mxu1 %vm1646_vm6, %v2791_v33 }
 0x480   : > { %4535 = vmatprep.mubr.msk.bf16.mxu1 %vm4967_vm10, %v4966_v41 }
 0x53a   : > { %v4433_v53 = vpop.f32.mrb[72].mxu1 }
 0x53b   : > { %2959 = vst.msk [vmem:[#allocation3 + $0x10] sm:$0xff] %vm1863_vm8, %v4433_v53  ;;  %v2894_v54 = vpop.f32.mrb[73].mxu1 }
 0x53c   : > { %2957 = vst.msk [vmem:[#allocation3] sm:$0xff] %vm1863_vm8, %v2894_v54  ;;  %v4434_v61 = vpop.f32.mrb[74].mxu1 }
 0x53d   : > { %2960 = vst.msk [vmem:[#allocation3 + $0x18] sm:$0xff] %vm1863_vm8, %v4434_v61  ;;  %v2897_v44 = vpop.f32.mrb[75].mxu1 }
 0x53e   : > { %2958 = vst.msk [vmem:[#allocation3 + $0x8] sm:$0xff] %vm1863_vm8, %v2897_v44 }
 0x542   : > { %v4437_v36 = vpop.f32.mrb[76].mxu1 }
 0x543   : > { %2963 = vst.msk [vmem:[#allocation3 + $0x30] sm:$0xff] %vm1863_vm8, %v4437_v36  ;;  %v2910_v30 = vpop.f32.mrb[77].mxu1  ;;  %v2974_v50 = vld [vmem:[#allocation3] ss:$16 sm:$0x3] }
 0x544   : > { %2961 = vst.msk [vmem:[#allocation3 + $0x20] sm:$0xff] %vm1863_vm8, %v2910_v30  ;;  %v4438_v45 = vpop.f32.mrb[78].mxu1  ;;  %v2982_v3 = vld [vmem:[#allocation3 + $0x1] ss:$16 sm:$0x3]  ;;  %v4879_v30 = vld [vmem:[%s6936_s8 + $0x48] sm:$0xff]  }
 0x545   : > { %2964 = vst.msk [vmem:[#allocation3 + $0x38] sm:$0xff] %vm1863_vm8, %v4438_v45  ;;  %v2913_v10 = vpop.f32.mrb[79].mxu1  ;;  %v3073_v4 = vld [vmem:[#allocation3 + $0x2] ss:$16 sm:$0x3] }
 0x546   : > { %2962 = vst.msk [vmem:[#allocation3 + $0x28] sm:$0xff] %vm1863_vm8, %v2913_v10  ;;  %v3081_v25 = vld [vmem:[#allocation3 + $0x3] ss:$16 sm:$0x3]  ;;  %v4880_v45 = vld [vmem:[%s6936_s8 + $0x50] ss:$0 sps:$4 sm:$0xff]  }
 0x547   : > { %v3167_v33 = vld [vmem:[#allocation3 + $0x4] ss:$16 sm:$0x3]  ;;  %v3175_v47 = vld [vmem:[#allocation3 + $0x5] ss:$16 sm:$0x3] }
 0x54a   : > { %v4441_v40 = vpop.f32.mrb[80].mxu1 }
 0x54b   : > { %2967 = vst.msk [vmem:[#allocation3 + $0x50] sm:$0xff] %vm1863_vm8, %v4441_v40  ;;  %v2926_v5 = vpop.f32.mrb[81].mxu1  ;;  %v2975_v35 = vld [vmem:[#allocation3] ss:$16 sm:$0xc]  ;;  %v3217_v40 = vsel %vm2228_vm7, %v4880_v45, 0 }
 0x54c   : > { %2965 = vst.msk [vmem:[#allocation3 + $0x40] sm:$0xff] %vm1863_vm8, %v2926_v5  ;;  %v4442_v8 = vpop.f32.mrb[82].mxu1  ;;  %v2983_v37 = vld [vmem:[#allocation3 + $0x1] ss:$16 sm:$0xc]  ;;  %v2976_v23 = vor.u32 %v2975_v35, %v2974_v50 }
 0x54d   : > { %2968 = vst.msk [vmem:[#allocation3 + $0x58] sm:$0xff] %vm1863_vm8, %v4442_v8  ;;  %v2929_v19 = vpop.f32.mrb[83].mxu1  ;;  %v2984_v51 = vor.u32 %v2983_v37, %v2982_v3  ;;  %v3074_v55 = vld [vmem:[#allocation3 + $0x2] ss:$16 sm:$0xc]  ;;  %v4881_v8 = vld [vmem:[%s6936_s8 + $0x54] sm:$0xff]  }
 0x54e   : > { %2966 = vst.msk [vmem:[#allocation3 + $0x48] sm:$0xff] %vm1863_vm8, %v2929_v19  ;;  %v3082_v56 = vld [vmem:[#allocation3 + $0x3] ss:$16 sm:$0xc]  ;;  %v3075_v57 = vor.u32 %v3074_v55, %v3073_v4  ;;  %v4892_v45 = vld [vmem:[%s6936_s8 + $0xa4] ss:$0 sps:$4 sm:$0xff]  }
 0x54f   : > { %v3083_v49 = vor.u32 %v3082_v56, %v3081_v25  ;;  %v3168_v9 = vld [vmem:[#allocation3 + $0x4] ss:$16 sm:$0xc]  ;;  %v3176_v43 = vld [vmem:[#allocation3 + $0x5] ss:$16 sm:$0xc] }
 0x550   : > { %v3169_v53 = vor.u32 %v3168_v9, %v3167_v33  ;;  %v3177_v54 = vor.u32 %v3176_v43, %v3175_v47  ;;  %v3261_v35 = vld [vmem:[#allocation3 + $0x6] ss:$16 sm:$0x3]  ;;  %v3356_v55 = vld [vmem:[#allocation3 + $0x8] ss:$16 sm:$0xc] }
 0x551   : > { %v3364_v56 = vld [vmem:[#allocation3 + $0x9] ss:$16 sm:$0xc]  ;;  %v3355_v4 = vld [vmem:[#allocation3 + $0x8] ss:$16 sm:$0x3] }
 0x552   : > { %v4445_v17 = vpop.f32.mrb[84].mxu1  ;;  %v3363_v25 = vld [vmem:[#allocation3 + $0x9] ss:$16 sm:$0x3] }
 0x553   : > { %2971 = vst.msk [vmem:[#allocation3 + $0x70] sm:$0xff] %vm1863_vm8, %v4445_v17  ;;  %v2942_v34 = vpop.f32.mrb[85].mxu1  ;;  %v2977_v16 = vld [vmem:[#allocation3] ss:$16 sm:$0x30] }
 0x554   : > { %2969 = vst.msk [vmem:[#allocation3 + $0x60] sm:$0xff] %vm1863_vm8, %v2942_v34  ;;  %v4446_v63 = vpop.f32.mrb[86].mxu1  ;;  %v2985_v38 = vld [vmem:[#allocation3 + $0x1] ss:$16 sm:$0x30]  ;;  %v2978_v24 = vor.u32 %v2977_v16, %v2976_v23 }
 0x555   : > { %2972 = vst.msk [vmem:[#allocation3 + $0x78] sm:$0xff] %vm1863_vm8, %v4446_v63  ;;  %v2945_v52 = vpop.f32.mrb[87].mxu1  ;;  %v2986_v1 = vor.u32 %v2985_v38, %v2984_v51  ;;  %v3076_v2 = vld [vmem:[#allocation3 + $0x2] ss:$16 sm:$0x30] }
 0x556   : > { %2970 = vst.msk [vmem:[#allocation3 + $0x68] sm:$0xff] %vm1863_vm8, %v2945_v52  ;;  %v3084_v12 = vld [vmem:[#allocation3 + $0x3] ss:$16 sm:$0x30]  ;;  %v3077_v26 = vor.u32 %v3076_v2, %v3075_v57  ;;  %v3357_v57 = vor.u32 %v3356_v55, %v3355_v4 }
 0x557   : > { %v3085_v18 = vor.u32 %v3084_v12, %v3083_v49  ;;  %v3170_v6 = vld [vmem:[#allocation3 + $0x4] ss:$16 sm:$0x30]  ;;  %v3178_v42 = vld [vmem:[#allocation3 + $0x5] ss:$16 sm:$0x30]  ;;  %v3365_v49 = vor.u32 %v3364_v56, %v3363_v25 }
 0x558   : > { %v3171_v36 = vor.u32 %v3170_v6, %v3169_v53  ;;  %v3179_v27 = vor.u32 %v3178_v42, %v3177_v54  ;;  %v4882_v17 = vld [vmem:[%s6936_s8 + $0x5c] sm:$0xff]   ;;  %v3262_v34 = vld [vmem:[#allocation3 + $0x6] ss:$16 sm:$0xc] }
 0x559   : > { %v3270_v63 = vld [vmem:[#allocation3 + $0x7] ss:$16 sm:$0xc]  ;;  %v3264_v37 = vld [vmem:[#allocation3 + $0x6] ss:$16 sm:$0x30]  ;;  %v3263_v3 = vor.u32 %v3262_v34, %v3261_v35 }
 0x55a   : > { %v3269_v52 = vld [vmem:[#allocation3 + $0x7] ss:$16 sm:$0x3]  ;;  %v3358_v2 = vld [vmem:[#allocation3 + $0x8] ss:$16 sm:$0x30] }
 0x55b   : > { %v2979_v29 = vld [vmem:[#allocation3] ss:$16 sm:$0xc0]  ;;  %v2987_v13 = vld [vmem:[#allocation3 + $0x1] ss:$16 sm:$0xc0]  ;;  %v3271_v16 = vor.u32 %v3270_v63, %v3269_v52  ;;  %v3265_v51 = vor.u32 %v3264_v37, %v3263_v3 }
 0x55c   : > { %v2980_v14 = vor.u32 %v2979_v29, %v2978_v24  ;;  %v2988_v48 = vor.u32 %v2987_v13, %v2986_v1  ;;  %v3078_v0 = vld [vmem:[#allocation3 + $0x2] ss:$16 sm:$0xc0]  ;;  %v3086_v59 = vld [vmem:[#allocation3 + $0x3] ss:$16 sm:$0xc0] }
 0x55d   : > { %v3079_v60 = vor.u32 %v3078_v0, %v3077_v26  ;;  %v3087_v7 = vor.u32 %v3086_v59, %v3085_v18  ;;  %v3172_v61 = vld [vmem:[#allocation3 + $0x4] ss:$16 sm:$0xc0]  ;;  %v3180_v44 = vld [vmem:[#allocation3 + $0x5] ss:$16 sm:$0xc0]  ;;  %v3359_v26 = vor.u32 %v3358_v2, %v3357_v57 }
 0x55e   : > { %v2989_v31 = vmax.f32 %v2980_v14, %v2988_v48  ;;  %v3173_v22 = vor.u32 %v3172_v61, %v3171_v36  ;;  %v3181_v10 = vor.u32 %v3180_v44, %v3179_v27  ;;  %v3272_v50 = vld [vmem:[#allocation3 + $0x7] ss:$16 sm:$0x30]  ;;  %v3266_v38 = vld [vmem:[#allocation3 + $0x6] ss:$16 sm:$0xc0] }
 0x55f   : > { %v3088_v32 = vmax.f32 %v3079_v60, %v3087_v7  ;;  %v3274_v23 = vld [vmem:[#allocation3 + $0x7] ss:$16 sm:$0xc0]  ;;  %v3273_v24 = vor.u32 %v3272_v50, %v3271_v16  ;;  %v4884_v29 = vld [vmem:[%s6936_s8 + $0x6c] ss:$0 sps:$4 sm:$0xff]   ;;  %v3267_v13 = vor.u32 %v3266_v38, %v3265_v51 }
 0x560   : > { %v2997_v20 = vpack.c.bf16 %v2989_v31, %v2989_v31  ;;  %v3182_v5 = vmax.f32 %v3173_v22, %v3181_v10  ;;  %v4883_v1 = vld [vmem:[%s6936_s8 + $0x64] sm:$0xff]   ;;  %v3311_v48 = vsel %vm2228_vm7, %v4884_v29, 0  ;;  %v3544_v34 = vld [vmem:[#allocation3 + $0xc] ss:$16 sm:$0xc] }
 0x561   : > { %v3097_v11 = vpack.c.bf16 %v3088_v32, %v3088_v32  ;;  %v3275_v14 = vor.u32 %v3274_v23, %v3273_v24  ;;  %v3366_v12 = vld [vmem:[#allocation3 + $0x9] ss:$16 sm:$0x30]  ;;  %v3360_v0 = vld [vmem:[#allocation3 + $0x8] ss:$16 sm:$0xc0] }
 0x562   : > { %4456 = vmatmul.mubr.msk.bf16.vlgmr.msra.gmra.mrb[32].mxu0 %vm1863_vm8, %v2997_v20  ;;  %v3191_v19 = vpack.c.bf16 %v3182_v5, %v3182_v5  ;;  %v3368_v59 = vld [vmem:[#allocation3 + $0x9] ss:$16 sm:$0xc0]  ;;  %v3367_v18 = vor.u32 %v3366_v12, %v3365_v49  ;;  %v3361_v60 = vor.u32 %v3360_v0, %v3359_v26  ;;  %v3450_v9 = vld [vmem:[#allocation3 + $0xa] ss:$16 sm:$0xc] }
 0x563   : > { %4460 = vmatpush3.bf16.msra.mxu0 %v4873_v39  ;;  %4467 = vmatprep.mubr.msk.bf16.mxu0 %vm4967_vm10, %v4966_v41  ;;  %v3276_v31 = vmax.f32 %v3267_v13, %v3275_v14  ;;  %v4885_v39 = vld [vmem:[%s6936_s8 + $0x70] sm:$0xff]   ;;  %v3458_v43 = vld [vmem:[#allocation3 + $0xb] ss:$16 sm:$0xc]  ;;  %v4896_v29 = vld [vmem:[%s6936_s8 + $0xc0] ss:$0 sps:$4 sm:$0xff]  }
 0x564   : > { %4461 = vmatprep.subr.bf16.mxu0 %v4966_v41  ;;  %v3369_v7 = vor.u32 %v3368_v59, %v3367_v18  ;;  %v3449_v33 = vld [vmem:[#allocation3 + $0xa] ss:$16 sm:$0x3]  ;;  %v3457_v47 = vld [vmem:[#allocation3 + $0xb] ss:$16 sm:$0x3] }
 0x565   : > { %v3285_v20 = vpack.c.bf16 %v3276_v31, %v3276_v31  ;;  %v3452_v6 = vld [vmem:[#allocation3 + $0xa] ss:$16 sm:$0x30]  ;;  %v3460_v42 = vld [vmem:[#allocation3 + $0xb] ss:$16 sm:$0x30]  ;;  %v3451_v53 = vor.u32 %v3450_v9, %v3449_v33  ;;  %v3459_v54 = vor.u32 %v3458_v43, %v3457_v47 }
 0x566   : > { %v3370_v32 = vmax.f32 %v3361_v60, %v3369_v7  ;;  %v3454_v61 = vld [vmem:[#allocation3 + $0xa] ss:$16 sm:$0xc0]  ;;  %v3462_v44 = vld [vmem:[#allocation3 + $0xb] ss:$16 sm:$0xc0] }
 0x567   : > { %4462 = vmatpush3.bf16.msra.mxu0 %v4874_v15  ;;  %v4886_v15 = vld [vmem:[%s6936_s8 + $0x78] sm:$0xff]   ;;  %v3453_v36 = vor.u32 %v3452_v6, %v3451_v53  ;;  %v3461_v27 = vor.u32 %v3460_v42, %v3459_v54  ;;  %v4017_v12 = vld [vmem:[%s6939_s11] ss:$0 sm:$0xff] }
 0x568   : > { %4463 = vmatprep.subr.bf16.mxu0 %v4966_v41  ;;  %v3552_v63 = vld [vmem:[#allocation3 + $0xd] ss:$16 sm:$0xc]  ;;  %v3543_v35 = vld [vmem:[#allocation3 + $0xc] ss:$16 sm:$0x3] }
 0x569   : > { %v3455_v22 = vor.u32 %v3454_v61, %v3453_v36  ;;  %v3463_v10 = vor.u32 %v3462_v44, %v3461_v27  ;;  %v3546_v52 = vld [vmem:[#allocation3 + $0xc] ss:$16 sm:$0x30]  ;;  %v3551_v37 = vld [vmem:[#allocation3 + $0xd] ss:$16 sm:$0x3]  ;;  %v3545_v3 = vor.u32 %v3544_v34, %v3543_v35 }
 0x56a   : > { %v3554_v50 = vld [vmem:[#allocation3 + $0xd] ss:$16 sm:$0x30]  ;;  %v3553_v16 = vor.u32 %v3552_v63, %v3551_v37  ;;  %v3548_v38 = vld [vmem:[#allocation3 + $0xc] ss:$16 sm:$0xc0] }
 0x56b   : > { %4464 = vmatpush3.bf16.msra.mxu0 %v4875_v62  ;;  %v4887_v62 = vld [vmem:[%s6936_s8 + $0x80] sm:$0xff]   ;;  %v3464_v5 = vmax.f32 %v3455_v22, %v3463_v10  ;;  %v3556_v23 = vld [vmem:[#allocation3 + $0xd] ss:$16 sm:$0xc0]  ;;  %v3547_v51 = vor.u32 %v3546_v52, %v3545_v3 }
 0x56c   : > { %4465 = vmatprep.subr.bf16.mxu0 %v4966_v41  ;;  %v3555_v24 = vor.u32 %v3554_v50, %v3553_v16 }
 0x56d   : > { %v3549_v13 = vor.u32 %v3548_v38, %v3547_v51 }
 0x56e   : > { %v3557_v14 = vor.u32 %v3556_v23, %v3555_v24 }
 0x56f   : > { %4466 = vmatpush3.bf16.msra.mxu0 %v3123_v28  ;;  %v3405_v28 = vsel %vm2228_vm7, %v4888_v46, 0 }
 0x570   : > { %4471 = vmatprep.subr.bf16.mxu0 %v4966_v41  ;;  %v3558_v31 = vmax.f32 %v3549_v13, %v3557_v14 }
 0x572   : > { %4468 = vmatmul.mubr.msk.bf16.vlgmr.msra.gmra.mrb[32].mxu0 %vm1863_vm8, %v3097_v11  ;;  %v3379_v11 = vpack.c.bf16 %v3370_v32, %v3370_v32 }
 0x573   : > { %4472 = vmatpush3.bf16.msra.mxu0 %v4877_v58  ;;  %4479 = vmatprep.mubr.msk.bf16.mxu0 %vm4967_vm10, %v4966_v41  ;;  %v4889_v58 = vld [vmem:[%s6936_s8 + $0x8c] sm:$0xff]  }
 0x574   : > { %4473 = vmatprep.subr.bf16.mxu0 %v4966_v41 }
 0x577   : > { %4474 = vmatpush3.bf16.msra.mxu0 %v4878_v21  ;;  %v4890_v21 = vld [vmem:[%s6936_s8 + $0x94] sm:$0xff]  }
 0x578   : > { %4475 = vmatprep.subr.bf16.mxu0 %v4966_v41 }
 0x57b   : > { %4476 = vmatpush3.bf16.msra.mxu0 %v4879_v30  ;;  %v4891_v30 = vld [vmem:[%s6936_s8 + $0x9c] sm:$0xff]  }
 0x57c   : > { %4477 = vmatprep.subr.bf16.mxu0 %v4966_v41 }
 0x57f   : > { %4478 = vmatpush3.bf16.msra.mxu0 %v3217_v40  ;;  %v3499_v40 = vsel %vm2228_vm7, %v4892_v45, 0 }
 0x580   : > { %4483 = vmatprep.subr.bf16.mxu0 %v4966_v41 }
 0x582   : > { %4480 = vmatmul.mubr.msk.bf16.vlgmr.msra.gmra.mrb[32].mxu0 %vm1863_vm8, %v3191_v19  ;;  %v3473_v19 = vpack.c.bf16 %v3464_v5, %v3464_v5 }
 0x583   : > { %4484 = vmatpush3.bf16.msra.mxu0 %v4881_v8  ;;  %4491 = vmatprep.mubr.msk.bf16.mxu0 %vm4967_vm10, %v4966_v41  ;;  %v4893_v8 = vld [vmem:[%s6936_s8 + $0xa8] sm:$0xff]  }
 0x584   : > { %4485 = vmatprep.subr.bf16.mxu0 %v4966_v41 }
 0x587   : > { %4486 = vmatpush3.bf16.msra.mxu0 %v4882_v17  ;;  %v4894_v17 = vld [vmem:[%s6936_s8 + $0xb0] sm:$0xff]  }
 0x588   : > { %4487 = vmatprep.subr.bf16.mxu0 %v4966_v41 }
 0x58b   : > { %4488 = vmatpush3.bf16.msra.mxu0 %v4883_v1  ;;  %v4895_v1 = vld [vmem:[%s6936_s8 + $0xb8] sm:$0xff]  }
 0x58c   : > { %4489 = vmatprep.subr.bf16.mxu0 %v4966_v41 }
 0x58f   : > { %4490 = vmatpush3.bf16.msra.mxu0 %v3311_v48  ;;  %v3593_v48 = vsel %vm2228_vm7, %v4896_v29, 0 }
 0x590   : > { %4495 = vmatprep.subr.bf16.mxu0 %v4966_v41 }
 0x592   : > { %4492 = vmatmul.mubr.msk.bf16.vlgmr.msra.gmra.mrb[32].mxu0 %vm1863_vm8, %v3285_v20  ;;  %v3944_v20 = vld [vmem:[%s6937_s9] ss:$0 sm:$0xff] }
 0x593   : > { %4496 = vmatpush3.bf16.msra.mxu0 %v4885_v39  ;;  %4503 = vmatprep.mubr.msk.bf16.mxu0 %vm4967_vm10, %v4966_v41  ;;  %v3567_v39 = vpack.c.bf16 %v3558_v31, %v3558_v31 }
 0x594   : > { %4497 = vmatprep.subr.bf16.mxu0 %v4966_v41 }
 0x597   : > { %4498 = vmatpush3.bf16.msra.mxu0 %v4886_v15 }
 0x598   : > { %4499 = vmatprep.subr.bf16.mxu0 %v4966_v41 }
 0x59b   : > { %4500 = vmatpush3.bf16.msra.mxu0 %v4887_v62 }
 0x59c   : > { %4501 = vmatprep.subr.bf16.mxu0 %v4966_v41 }
 0x59f   : > { %4502 = vmatpush3.bf16.msra.mxu0 %v3405_v28 }
 0x5a0   : > { %4507 = vmatprep.subr.bf16.mxu0 %v4966_v41 }
 0x5a2   : > { %4504 = vmatmul.mubr.msk.bf16.vlgmr.msra.gmra.mrb[32].mxu0 %vm1863_vm8, %v3379_v11 }
 0x5a3   : > { %4508 = vmatpush3.bf16.msra.mxu0 %v4889_v58  ;;  %4515 = vmatprep.mubr.msk.bf16.mxu0 %vm4967_vm10, %v4966_v41 }
 0x5a4   : > { %4509 = vmatprep.subr.bf16.mxu0 %v4966_v41 }
 0x5a7   : > { %4510 = vmatpush3.bf16.msra.mxu0 %v4890_v21 }
 0x5a8   : > { %4511 = vmatprep.subr.bf16.mxu0 %v4966_v41 }
 0x5ab   : > { %4512 = vmatpush3.bf16.msra.mxu0 %v4891_v30 }
 0x5ac   : > { %4513 = vmatprep.subr.bf16.mxu0 %v4966_v41 }
 0x5af   : > { %4514 = vmatpush3.bf16.msra.mxu0 %v3499_v40 }
 0x5b0   : > { %4519 = vmatprep.subr.bf16.mxu0 %v4966_v41 }
 0x5b2   : > { %4516 = vmatmul.mubr.msk.bf16.vlgmr.msra.gmra.mrb[32].mxu0 %vm1863_vm8, %v3473_v19 }
 0x5b3   : > { %4520 = vmatpush3.bf16.msra.mxu0 %v4893_v8  ;;  %4527 = vmatprep.mubr.msk.bf16.mxu0 %vm4967_vm10, %v4966_v41 }
 0x5b4   : > { %4521 = vmatprep.subr.bf16.mxu0 %v4966_v41 }
 0x5b7   : > { %4522 = vmatpush3.bf16.msra.mxu0 %v4894_v17 }
 0x5b8   : > { %4523 = vmatprep.subr.bf16.mxu0 %v4966_v41 }
 0x5bb   : > { %4524 = vmatpush3.bf16.msra.mxu0 %v4895_v1 }
 0x5bc   : > { %4525 = vmatprep.subr.bf16.mxu0 %v4966_v41 }
 0x5bf   : > { %4526 = vmatpush3.bf16.msra.mxu0 %v3593_v48 }
 0x5c2   : > { %4528 = vmatmul.mubr.msk.bf16.vlgmr.msra.gmra.mrb[32].mxu0 %vm1863_vm8, %v3567_v39 }
 0x695   : > { %v3629_v15 = vpop.f32.mrb[32].mxu0 }
 0x696   : > { %v4567_v55 = vadd.f32 %v3944_v20, %v3629_v15  ;;  %v4529_v56 = vpop.f32.mrb[33].mxu0 }
 0x697   : > { %v3632_v4 = vpop.f32.mrb[34].mxu0 }
 0x698   : > { %v3636_v25 = vmax.f32 %v4567_v55, 0.0  ;;  %v4530_v2 = vpop.f32.mrb[35].mxu0 }
 0x69a   : > { %v3641_v41 = vpack.c.bf16 %v3636_v25, %v3636_v25 }
 0x69c   : > { %4536 = vmatmul.mubr.msk.bf16.vlgmr.msra.gmra.mrb[88].mxu1 %vm3661_vm11, %v3641_v41 }
 0x76f   : > { %v3699_v57 = vpop.f32.mrb[88].mxu1 }
 0x770   : > { %v3700_v49 = vadd.f32 %v4017_v12, %v3699_v57  ;;  %v4537_v0 = vpop.f32.mrb[89].mxu1 }
 0x771   : > { %v3702_v59 = vpop.f32.mrb[90].mxu1 }
 0x772   : > { %v4538_v26 = vpop.f32.mrb[91].mxu1  ;;  %3706 = vst.msk [vmem:[%s407_s28] sm:$0xff] %vm3705_vm12, %v3700_v49 }
 0x773   : > { %4912 = shalt.err (!%p4909_p3)
}
 0x774   : > { %s4913_s18 = scalar_lea.hbm %s6886_s17, 128  ;;  %s4917_s16 = scalar_lea.hbm %s6940_s12, 256 }
 0x775   : > { %p4914_p4 = scmp.ne.s32.totalorder %s6886_s17, %s4913_s18  ;;  %p4918_p9 = scmp.lt.u32.totalorder %s6886_s17, %s6940_s12 }
 0x776   : > { %p4919_p10 = scmp.lt.u32.totalorder %s4917_s16, %s4913_s18  ;;  %p4921_p12 = scmp.lt.u32.totalorder %s4913_s18, %s6886_s17 }
 0x777   : > { %p4915_p7 = pnand %p4914_p4, %p5072_p5 }
 0x778   : > { %p4920_p11 = por %p4919_p10, %p4918_p9 }
 0x779   : > { %p4916_p8 = pneg %p4915_p7 }
 0x77a   : > { %p4922_p13 = por %p4921_p12, %p4920_p11 }
 0x77c   : > { %p4923_p0 = pnand %p4922_p13, %p4916_p8 }
 0x77e   : > { %4926 = shalt.err (!%p4923_p0)
}
 0x77f   : > { %4671 = dma.vmem_to_hbm [thread:$0]  (%p5072_p5), %s6888_s29, 128, %s6886_s17, %s3708_s25  }
 0x780 PF: > { %p4677_p1 = scmp.ge.s32.totalorder %s4961_s24, 2  ;;  %s3733_s19 = sand.u32 1, %s4949_s21  }
 0x781   : > { %s3734_s15 = scalar_lea.sflag [#allocation5], %s3733_s19 }
 0x782   : > { %p4674_p2 = pnand %p4677_p1, %p5076_p6 }
 0x784   : > { %4944 = dma.done.wait (!%p4674_p2), %s3734_s15, 128  }
 0x785   : > { %4946 = vsyncadd (!%p4674_p2), %s3734_s15, 4294967168  ;;  %p22_p3 = scmp.ge.s32.totalorder %s5059_s27, 4   ;;  %s7050_s21 = smov %s4953_s22 }
 0x786   : > { %s7051_s22 = smov %s4957_s23  ;;  %s7052_s23 = smov %s5070_s30 }
 0x787   : > { %s7053_s24 = smov %s5059_s27  ;;  %24 = sbr.rel (!%p22_p3) target bundleno = 5 (0x5), region = 157 }
 0x78e   :  { %3739 = vsyncpa [#allocation5], 1 }
 0x78f   :  { %3741 = vsyncpa [#allocation5 + $0x1], 1 }

</bundles_post_ra>
